<compile_context>
chip_gen: v7x
topology: tpu7x:2x2x1
jax: 0.10.0
libtpu: 0.0.40
codegen_flags: <defaults>
</compile_context>

<pallas_src>
import functools

import jax
import jax.numpy as jnp
from jax.experimental import pallas as pl
from jax.experimental.pallas import tpu as pltpu


COMPUTE_DTYPE = jnp.bfloat16      # MXU operand dtype (f32 accumulation)
STORE_DTYPE = jnp.bfloat16        # inter-kernel activation dtype in HBM


def _tpu_vmem_bytes():
    try:
        info = pltpu.get_tpu_info()
        for attr in ("vmem_capacity_bytes", "vmem_size_bytes", "vmem_bytes"):
            v = getattr(info, attr, None)
            if v:
                return int(v)
    except Exception:
        pass
    return 64 * 1024 * 1024       # conservative: v7x per-TensorCore VMEM


def _budget():
    vmem = _tpu_vmem_bytes()
    if vmem >= 96 * 1024 * 1024:
        # v5e / v6e: 128 MiB physical VMEM -> big mem-bound tiles
        return dict(vmem_limit=100 * 1024 * 1024, row_target=512,
                    lane_target=1024, chunk_target=128)
    # v7x: 64 MiB per TC -> conservative tiles, leave double-buffer headroom
    return dict(vmem_limit=48 * 1024 * 1024, row_target=256,
                lane_target=512, chunk_target=128)


BUDGET = _budget()
VMEM_LIMIT_BYTES = BUDGET["vmem_limit"]


# ----------------------------- in-kernel helpers -----------------------------

def _sigmoid(x):
    return 1.0 / (1.0 + jnp.exp(-x))


def _silu(x):
    return x * _sigmoid(x)


def _softplus(x):
    # numerically-stable softplus using only exp/log/abs/max
    return jnp.maximum(x, 0.0) + jnp.log(1.0 + jnp.exp(-jnp.abs(x)))


def _gelu_tanh(x):
    # tanh approximation: runs on the EUP slot instead of a ~12-op VALU erf poly
    c = 0.7978845608028654  # sqrt(2/pi)
    return 0.5 * x * (1.0 + jnp.tanh(c * (x + 0.044715 * x * x * x)))


def _expand_heads(a, P):
    """(Q, H) -> (Q, H*P): repeat each head column across its P lanes.

    Built from lane-broadcasts + one concatenate (layout-safe in Mosaic).
    """
    Q, H = a.shape
    return jnp.concatenate(
        [jnp.broadcast_to(a[:, h:h + 1], (Q, P)) for h in range(H)], axis=1)


# ------------------------------- tiling helpers -------------------------------

def _row_tile(m, target):
    """Largest row tile <= target that divides m and is sublane (8) aligned."""
    # TODO(synk): pad M to a tile multiple instead of falling back to full-M
    # blocks when M is large and has no small divisor.
    if m <= target:
        return m
    for t in range(target, 7, -1):
        if t % 8 == 0 and m % t == 0:
            return t
    return m


def _lane_tile(n, target):
    """Largest lane tile <= target that divides n and is a multiple of 128."""
    if n <= target:
        return n
    t = (target // 128) * 128
    while t >= 128:
        if n % t == 0:
            return t
        t -= 128
    return n


def _chunk_len(L, target):
    """SSD chunk length: largest divisor of L that is <= target and 8-aligned."""
    if L <= target:
        return L
    for q in range(target, 7, -1):
        if q % 8 == 0 and L % q == 0:
            return q
    return L


# ------------------------------- 1. in_proj -----------------------------------
# One merged matmul (z | xBC | dt), split in-kernel; bf16 weight resident.

def _make_in_proj_kernel(d_inner, conv_dim, cdt):
    def kernel(u_ref, w_ref, z_ref, xbc_ref, dt_ref):
        p = jnp.dot(u_ref[...].astype(cdt), w_ref[...],
                    preferred_element_type=jnp.float32)
        z_ref[...] = p[:, :d_inner].astype(z_ref.dtype)
        xbc_ref[...] = p[:, d_inner:d_inner + conv_dim].astype(xbc_ref.dtype)
        dt_ref[...] = p[:, d_inner + conv_dim:]
    return kernel


def in_proj(u2d, w_in, d_inner, conv_dim, H):
    M, Dm = u2d.shape
    dout = w_in.shape[1]
    tm = _row_tile(M, BUDGET["row_target"])
    return pl.pallas_call(
        _make_in_proj_kernel(d_inner, conv_dim, COMPUTE_DTYPE),
        grid=(M // tm,),
        in_specs=[
            pl.BlockSpec((tm, Dm), lambda i: (i, 0)),
            pl.BlockSpec((Dm, dout), lambda i: (0, 0)),    # bf16 weight, resident
        ],
        out_specs=(
            pl.BlockSpec((tm, d_inner), lambda i: (i, 0)),
            pl.BlockSpec((tm, conv_dim), lambda i: (i, 0)),
            pl.BlockSpec((tm, H), lambda i: (i, 0)),
        ),
        out_shape=(
            jax.ShapeDtypeStruct((M, d_inner), STORE_DTYPE),
            jax.ShapeDtypeStruct((M, conv_dim), STORE_DTYPE),
            jax.ShapeDtypeStruct((M, H), jnp.float32),
        ),
        compiler_params=pltpu.CompilerParams(
            dimension_semantics=("parallel",),
            vmem_limit_bytes=VMEM_LIMIT_BYTES),
        cost_estimate=pl.CostEstimate(
            flops=2 * M * Dm * dout,
            transcendentals=0,
            bytes_accessed=4 * M * Dm + 2 * (Dm * dout + M * dout)),
    )(u2d, w_in)


# ----------------------- 2. causal depthwise conv + SiLU -----------------------
# Tap shifts via pltpu.roll (XLU) + sublane mask; B/C kept packed lane-dense.

def _make_conv_kernel(L, K, d_inner):
    def kernel(xbc_ref, w_ref, b_ref, ox_ref, obc_ref):
        f32 = jnp.float32
        x = xbc_ref[0].astype(f32)                       # (L, C)
        w = w_ref[...]                                   # (K, C) f32
        t_idx = jax.lax.broadcasted_iota(jnp.int32, (L, 1), 0)
        acc = x * w[K - 1:K, :]                          # tap with zero shift
        for k in range(K - 1):                           # K is tiny (=4): unroll
            s = K - 1 - k                                # causal shift of tap k
            shifted = jnp.where(t_idx >= s, pltpu.roll(x, shift=s, axis=0), 0.0)
            acc = acc + shifted * w[k:k + 1, :]
        y = _silu(acc + b_ref[...])
        ox_ref[0] = y[:, :d_inner].astype(ox_ref.dtype)
        obc_ref[0] = y[:, d_inner:].astype(obc_ref.dtype)   # packed B|C (L, 2N)
    return kernel


def conv1d_silu_split(xbc, conv_w, conv_b, d_inner):
    # TODO(synk): for very long L, tile the sequence with a (K-1)-row halo and
    # add a channel-tile 'parallel' axis (more grid work for v7x's 2 TCs).
    Bb, L, C = xbc.shape
    K = conv_w.shape[0]
    n_bc = C - d_inner                                   # 2*ngroups*d_state
    return pl.pallas_call(
        _make_conv_kernel(L, K, d_inner),
        grid=(Bb,),
        in_specs=[
            pl.BlockSpec((1, L, C), lambda b: (b, 0, 0)),
            pl.BlockSpec((K, C), lambda b: (0, 0)),
            pl.BlockSpec((1, C), lambda b: (0, 0)),
        ],
        out_specs=(
            pl.BlockSpec((1, L, d_inner), lambda b: (b, 0, 0)),
            pl.BlockSpec((1, L, n_bc), lambda b: (b, 0, 0)),
        ),
        out_shape=(
            jax.ShapeDtypeStruct((Bb, L, d_inner), STORE_DTYPE),
            jax.ShapeDtypeStruct((Bb, L, n_bc), STORE_DTYPE),
        ),
        compiler_params=pltpu.CompilerParams(
            dimension_semantics=("parallel",),
            vmem_limit_bytes=VMEM_LIMIT_BYTES),
    )(xbc, conv_w, conv_b.reshape(1, C))


# --------------------------------- 3. SSD --------------------------------------
# Chunked state-space duality with factored decay:
#   y[t] = exp(rcs_h[t]) * ( sum_{s<=t,chunk} (C_t.B_s) * exp(-rcs_h[s])*dt_h[s]*x[s]
#                            + C_t . S_prev )            + D_h * x[t]
#   S_new = exp(rcs_h[last]) * ( S_prev + B_chunk^T @ Xs )
# where rcs is the chunk-local inclusive cumsum of dt*A (<= 0), so all per-head
# exps are only 2*Q*H per chunk and every MXU matmul is lane-dense (H*P wide).

def _make_ssd_kernel(Q, H, P, N, cdt):
    def kernel(x_ref, dt_ref, bc_ref, alog_ref, dtb_ref, dfull_ref, o_ref, s_ref):
        f32 = jnp.float32
        c = pl.program_id(1)

        @pl.when(c == 0)
        def _():
            s_ref[...] = jnp.zeros_like(s_ref)           # reset state per batch

        x = x_ref[0].astype(f32)                          # (Q, H*P)
        bc = bc_ref[0]                                    # (Q, 2N) bf16
        Bm = bc[:, :N]                                    # (Q, N)
        Cm = bc[:, N:]                                    # (Q, N)

        A = -jnp.exp(alog_ref[...])                       # (1, H)
        dt_sp = _softplus(dt_ref[0] + dtb_ref[...])       # (Q, H) f32
        dA = dt_sp * A                                    # (Q, H), all <= 0

        row = jax.lax.broadcasted_iota(jnp.int32, (Q, Q), 0)
        col = jax.lax.broadcasted_iota(jnp.int32, (Q, Q), 1)
        causal = col <= row
        tril = causal.astype(f32)

        # Chunk-local inclusive cumsum of dt*A for all heads at once (1 matmul).
        rcs = jnp.dot(tril, dA, preferred_element_type=f32)      # (Q, H), <= 0

        # Factored decay scales, expanded to lane-dense (Q, H*P).
        # TODO(synk): exp(-rcs) can overflow for extreme dt*A within a chunk;
        # lower BUDGET["chunk_target"] if decay rates are pathological.
        row_s = _expand_heads(jnp.exp(rcs), P)                   # (Q, H*P)
        col_s = _expand_heads(jnp.exp(-rcs) * dt_sp, P)          # (Q, H*P)

        xs = (col_s * x).astype(cdt)                             # (Q, H*P)

        # C_t . B_s shared by all heads (ngroups == 1); single causal mask.
        cb = jax.lax.dot_general(Cm, Bm, (((1,), (1,)), ((), ())),
                                 preferred_element_type=f32)     # (Q, Q)
        mcb = jnp.where(causal, cb, 0.0).astype(cdt)

        intra = jnp.dot(mcb, xs, preferred_element_type=f32)     # (Q, H*P)
        inter = jnp.dot(Cm, s_ref[...].astype(cdt),
                        preferred_element_type=f32)              # (Q, H*P)
        y = row_s * (intra + inter) + dfull_ref[...] * x
        o_ref[0] = y.astype(o_ref.dtype)                         # lane-dense write

        @pl.when(c < pl.num_programs(1) - 1)
        def _():
            snew = s_ref[...] + jax.lax.dot_general(
                Bm, xs, (((0,), (0,)), ((), ())),
                preferred_element_type=f32)                      # (N, H*P)
            s_ref[...] = row_s[Q - 1:Q, :] * snew
    return kernel


def ssd(x, dt, bc, A_log, dt_bias, D, headdim, d_state):
    Bb, L, d_inner = x.shape
    H = dt.shape[-1]
    P = headdim
    N = d_state
    Q = _chunk_len(L, BUDGET["chunk_target"])
    n_chunks = L // Q
    d_full = jnp.repeat(D, P).reshape(1, d_inner)      # per-channel skip gain
    return pl.pallas_call(
        _make_ssd_kernel(Q, H, P, N, COMPUTE_DTYPE),
        grid=(Bb, n_chunks),
        in_specs=[
            pl.BlockSpec((1, Q, d_inner), lambda b, c: (b, c, 0)),
            pl.BlockSpec((1, Q, H), lambda b, c: (b, c, 0)),
            pl.BlockSpec((1, Q, 2 * N), lambda b, c: (b, c, 0)),
            pl.BlockSpec((1, H), lambda b, c: (0, 0)),
            pl.BlockSpec((1, H), lambda b, c: (0, 0)),
            pl.BlockSpec((1, d_inner), lambda b, c: (0, 0)),
        ],
        out_specs=pl.BlockSpec((1, Q, d_inner), lambda b, c: (b, c, 0)),
        out_shape=jax.ShapeDtypeStruct((Bb, L, d_inner), STORE_DTYPE),
        scratch_shapes=[pltpu.VMEM((N, d_inner), jnp.float32)],   # carried state
        compiler_params=pltpu.CompilerParams(
            dimension_semantics=("parallel", "arbitrary"),
            vmem_limit_bytes=VMEM_LIMIT_BYTES),
        cost_estimate=pl.CostEstimate(
            flops=2 * Bb * L * (Q * (N + d_inner) + 2 * N * d_inner),
            transcendentals=Bb * L * 2 * H,
            bytes_accessed=2 * Bb * L * (2 * d_inner + 2 * N) + 4 * Bb * L * H),
    )(x, dt, bc, A_log.reshape(1, H), dt_bias.reshape(1, H), d_full)


# ------------- 4. fused gated-RMSNorm + out_proj + residual + LayerNorm --------

def _make_tail_kernel(cdt):
    def kernel(y_ref, z_ref, u_ref, rmsw_ref, wout_ref, lnw_ref, lnb_ref, o_ref):
        f32 = jnp.float32
        # RMSNormGated (norm_before_gate=False): g = rmsnorm(y * silu(z)) * w
        g = y_ref[...].astype(f32) * _silu(z_ref[...].astype(f32))
        var = jnp.mean(g * g, axis=-1, keepdims=True)
        g = g * jax.lax.rsqrt(var + 1e-5) * rmsw_ref[...]
        # out_proj + residual + LayerNorm (dropout p=0 -> identity)
        h = jnp.dot(g.astype(cdt), wout_ref[...],
                    preferred_element_type=f32) + u_ref[...]
        mu = jnp.mean(h, axis=-1, keepdims=True)
        hc = h - mu
        var2 = jnp.mean(hc * hc, axis=-1, keepdims=True)
        o_ref[...] = (hc * jax.lax.rsqrt(var2 + 1e-5) * lnw_ref[...]
                      + lnb_ref[...]).astype(o_ref.dtype)
    return kernel


def ssd_block_tail(y2d, z2d, u2d, rms_w, out_proj_w, ln_w, ln_b):
    M, d_inner = y2d.shape
    Dm = out_proj_w.shape[1]
    tm = _row_tile(M, BUDGET["row_target"])
    return pl.pallas_call(
        _make_tail_kernel(COMPUTE_DTYPE),
        grid=(M // tm,),
        in_specs=[
            pl.BlockSpec((tm, d_inner), lambda i: (i, 0)),
            pl.BlockSpec((tm, d_inner), lambda i: (i, 0)),
            pl.BlockSpec((tm, Dm), lambda i: (i, 0)),
            pl.BlockSpec((1, d_inner), lambda i: (0, 0)),
            pl.BlockSpec((d_inner, Dm), lambda i: (0, 0)),    # bf16 weight resident
            pl.BlockSpec((1, Dm), lambda i: (0, 0)),
            pl.BlockSpec((1, Dm), lambda i: (0, 0)),
        ],
        out_specs=pl.BlockSpec((tm, Dm), lambda i: (i, 0)),
        out_shape=jax.ShapeDtypeStruct((M, Dm), STORE_DTYPE),
        compiler_params=pltpu.CompilerParams(
            dimension_semantics=("parallel",),
            vmem_limit_bytes=VMEM_LIMIT_BYTES),
        cost_estimate=pl.CostEstimate(
            flops=2 * M * d_inner * Dm,
            transcendentals=M * d_inner,
            bytes_accessed=2 * (2 * M * d_inner + 2 * M * Dm + d_inner * Dm)),
    )(y2d, z2d, u2d, rms_w.reshape(1, d_inner), out_proj_w,
      ln_w.reshape(1, Dm), ln_b.reshape(1, Dm))


# ---------------- 5. fused FFN (gate/down/GELU/up + residual + LayerNorm) -------

def _make_ffn_kernel(cdt):
    def kernel(x_ref, wg_ref, bg_ref, wd_ref, bd_ref, wu_ref, bu_ref,
               lnw_ref, lnb_ref, o_ref, acc_ref):
        f32 = jnp.float32
        j = pl.program_id(1)

        @pl.when(j == 0)
        def _():
            acc_ref[...] = jnp.zeros_like(acc_ref)

        xb = x_ref[...].astype(cdt)
        x1 = jnp.dot(xb, wg_ref[...], preferred_element_type=f32) + bg_ref[...]
        x2 = jnp.dot(xb, wd_ref[...], preferred_element_type=f32) + bd_ref[...]
        g = _gelu_tanh(x1) * x2
        acc_ref[...] += jnp.dot(g.astype(cdt), wu_ref[...],
                                preferred_element_type=f32)

        @pl.when(j == pl.num_programs(1) - 1)
        def _():
            h = acc_ref[...] + bu_ref[...] + x_ref[...].astype(f32)  # + residual
            mu = jnp.mean(h, axis=-1, keepdims=True)
            hc = h - mu
            var = jnp.mean(hc * hc, axis=-1, keepdims=True)
            o_ref[...] = (hc * jax.lax.rsqrt(var + 1e-5) * lnw_ref[...]
                          + lnb_ref[...]).astype(o_ref.dtype)
    return kernel


def ffn_block(x2d, gate_w, gate_b, down_w, down_b, up_w, up_b, ln_w, ln_b):
    # TODO(synk): weights are re-streamed once per row tile; for very large M,
    # make the M-slab the resident accumulator and loop d_ff as the outer axis.
    M, Dm = x2d.shape
    d_ff = gate_w.shape[1]
    tm = _row_tile(M, BUDGET["row_target"])
    tf = _lane_tile(d_ff, BUDGET["lane_target"])  # d_ff split keeps VMEM bounded
    return pl.pallas_call(
        _make_ffn_kernel(COMPUTE_DTYPE),
        grid=(M // tm, d_ff // tf),
        in_specs=[
            pl.BlockSpec((tm, Dm), lambda i, j: (i, 0)),
            pl.BlockSpec((Dm, tf), lambda i, j: (0, j)),
            pl.BlockSpec((1, tf), lambda i, j: (0, j)),
            pl.BlockSpec((Dm, tf), lambda i, j: (0, j)),
            pl.BlockSpec((1, tf), lambda i, j: (0, j)),
            pl.BlockSpec((tf, Dm), lambda i, j: (j, 0)),
            pl.BlockSpec((1, Dm), lambda i, j: (0, 0)),
            pl.BlockSpec((1, Dm), lambda i, j: (0, 0)),
            pl.BlockSpec((1, Dm), lambda i, j: (0, 0)),
        ],
        out_specs=pl.BlockSpec((tm, Dm), lambda i, j: (i, 0)),
        out_shape=jax.ShapeDtypeStruct((M, Dm), jnp.float32),
        scratch_shapes=[pltpu.VMEM((tm, Dm), jnp.float32)],
        compiler_params=pltpu.CompilerParams(
            dimension_semantics=("parallel", "arbitrary"),
            vmem_limit_bytes=VMEM_LIMIT_BYTES),
        cost_estimate=pl.CostEstimate(
            flops=6 * M * Dm * d_ff,
            transcendentals=M * d_ff,
            bytes_accessed=2 * (2 * M * Dm + 3 * Dm * d_ff) + 4 * (2 * d_ff + 3 * Dm)),
    )(x2d, gate_w, gate_b.reshape(1, d_ff), down_w, down_b.reshape(1, d_ff),
      up_w, up_b.reshape(1, Dm), ln_w.reshape(1, Dm), ln_b.reshape(1, Dm))


# -------------------------- parameters & forward glue --------------------------

def init_params(key, d_model, headdim=32, d_state=64, d_conv=4, expand=2):
    d_inner = expand * d_model
    nheads = d_inner // headdim
    ngroups = 1
    conv_dim = d_inner + 2 * ngroups * d_state
    d_ff = 4 * d_model
    ks = jax.random.split(key, 12)
    s = 0.05
    bf = jnp.bfloat16
    w_z = jax.random.normal(ks[0], (d_model, d_inner), jnp.float32) * s
    w_xbc = jax.random.normal(ks[1], (d_model, conv_dim), jnp.float32) * s
    w_dt = jax.random.normal(ks[2], (d_model, nheads), jnp.float32) * s
    p = dict(
        # merged in_proj weight z | xBC | dt (no bias, as in Mamba2), stored bf16
        in_proj_w=jnp.concatenate([w_z, w_xbc, w_dt], axis=1).astype(bf),
        conv_w=jax.random.normal(ks[3], (d_conv, conv_dim), jnp.float32) * s,
        conv_b=jnp.zeros((conv_dim,), jnp.float32),
        dt_bias=jax.random.uniform(ks[4], (nheads,), jnp.float32, -0.5, 0.5),
        A_log=jnp.log(jnp.linspace(1.0, 4.0, nheads).astype(jnp.float32)),
        D=jnp.ones((nheads,), jnp.float32),
        rms_w=jnp.ones((d_inner,), jnp.float32),
        out_proj_w=(jax.random.normal(ks[5], (d_inner, d_model), jnp.float32) * s
                    ).astype(bf),
        ln1_w=jnp.ones((d_model,), jnp.float32),
        ln1_b=jnp.zeros((d_model,), jnp.float32),
        gate_w=(jax.random.normal(ks[6], (d_model, d_ff), jnp.float32) * s).astype(bf),
        gate_b=jax.random.normal(ks[7], (d_ff,), jnp.float32) * s,
        down_w=(jax.random.normal(ks[8], (d_model, d_ff), jnp.float32) * s).astype(bf),
        down_b=jax.random.normal(ks[9], (d_ff,), jnp.float32) * s,
        up_w=(jax.random.normal(ks[10], (d_ff, d_model), jnp.float32) * s).astype(bf),
        up_b=jax.random.normal(ks[11], (d_model,), jnp.float32) * s,
        ln2_w=jnp.ones((d_model,), jnp.float32),
        ln2_b=jnp.zeros((d_model,), jnp.float32),
    )
    dims = dict(d_inner=d_inner, nheads=nheads, headdim=headdim,
                d_state=d_state, d_conv=d_conv, conv_dim=conv_dim)
    return p, dims


def backbone_forward(u, p, dims):
    Bb, L, Dm = u.shape
    d_inner = dims["d_inner"]
    H = dims["nheads"]
    P = dims["headdim"]
    N = dims["d_state"]
    conv_dim = dims["conv_dim"]
    M = Bb * L

    u2d = u.reshape(M, Dm)

    # ------------- StateSpaceDualityBlock (Mamba2 + residual + LayerNorm) ------
    z2d, xbc2d, dt2d = in_proj(u2d, p["in_proj_w"], d_inner, conv_dim, H)

    xconv, bc = conv1d_silu_split(xbc2d.reshape(Bb, L, conv_dim),
                                  p["conv_w"], p["conv_b"], d_inner)

    y = ssd(xconv, dt2d.reshape(Bb, L, H), bc,
            p["A_log"], p["dt_bias"], p["D"], P, N)

    x1 = ssd_block_tail(y.reshape(M, d_inner), z2d, u2d, p["rms_w"],
                        p["out_proj_w"], p["ln1_w"], p["ln1_b"])

    # ----------------------------------- FFNBlock ------------------------------
    out2d = ffn_block(x1, p["gate_w"], p["gate_b"], p["down_w"], p["down_b"],
                      p["up_w"], p["up_b"], p["ln2_w"], p["ln2_b"])
    return out2d.reshape(Bb, L, Dm)


# ----------------------------------- main --------------------------------------

if __name__ == "__main__":
    d_model = 64
    batch, seqlen = 2, 16

    key = jax.random.PRNGKey(0)
    kx, kp = jax.random.split(key)
    x = jax.random.normal(kx, (batch, seqlen, d_model), jnp.float32)
    params, dims = init_params(kp, d_model, headdim=32)

    fwd = jax.jit(functools.partial(backbone_forward, dims=dims))
    out = fwd(x, params)
    jax.block_until_ready(out)
    assert out.shape == (batch, seqlen, d_model)
    assert bool(jnp.all(jnp.isfinite(out)))
    print("KERNEL_OK")
</pallas_src>

<mosaic_0001>
module attributes {stable_mosaic.version = 11 : i64} {
  func.func @kernel(%arg0: i32, %arg1: memref<1x16x256xbf16, #tpu.memory_space<vmem>>, %arg2: memref<4x256xf32, #tpu.memory_space<vmem>>, %arg3: memref<1x256xf32, #tpu.memory_space<vmem>>, %arg4: memref<1x16x128xbf16, #tpu.memory_space<vmem>>, %arg5: memref<1x16x128xbf16, #tpu.memory_space<vmem>>) attributes {dimension_semantics = [#tpu.dimension_semantics<parallel>], iteration_bounds = array<i64: 2>, scalar_prefetch = 0 : i64, scratch_operands = 0 : i64, tpu.core_type = #tpu.core_type<tc>, window_params = [{transform_indices = @transform_0, window_bounds = array<i64: 1, 16, 256>}, {pipeline_mode = #tpu.pipeline_mode<synchronous>, transform_indices = @transform_1, window_bounds = array<i64: 4, 256>}, {pipeline_mode = #tpu.pipeline_mode<synchronous>, transform_indices = @transform_2, window_bounds = array<i64: 1, 256>}, {transform_indices = @transform_3, window_bounds = array<i64: 1, 16, 128>}, {transform_indices = @transform_4, window_bounds = array<i64: 1, 16, 128>}]} {
    %c0 = arith.constant 0 : index
    %c0_0 = arith.constant 0 : index
    %c0_1 = arith.constant 0 : index
    %0 = vector.load %arg1[%c0, %c0_0, %c0_1] : memref<1x16x256xbf16, #tpu.memory_space<vmem>>, vector<1x16x256xbf16>
    %1 = vector.shape_cast %0 : vector<1x16x256xbf16> to vector<16x256xbf16>
    %2 = arith.extf %1 : vector<16x256xbf16> to vector<16x256xf32>
    %c0_2 = arith.constant 0 : index
    %c0_3 = arith.constant 0 : index
    %3 = vector.load %arg2[%c0_2, %c0_3] : memref<4x256xf32, #tpu.memory_space<vmem>>, vector<4x256xf32>
    %4 = tpu.iota {dimensions = array<i32: 0>} : vector<16x1xi32>
    %5 = vector.extract_strided_slice %3 {offsets = [3, 0], sizes = [1, 256], strides = [1, 1]} : vector<4x256xf32> to vector<1x256xf32>
    %6 = vector.broadcast %5 : vector<1x256xf32> to vector<16x256xf32>
    %7 = arith.mulf %2, %6 : vector<16x256xf32>
    %c3_i32 = arith.constant 3 : i32
    %8 = vector.broadcast %c3_i32 : i32 to vector<16x1xi32>
    %9 = arith.cmpi sge, %4, %8 : vector<16x1xi32>
    %c3_i32_4 = arith.constant 3 : i32
    %10 = tpu.dynamic_rotate %2 by %c3_i32_4 dim 0 : vector<16x256xf32>, i32 -> vector<16x256xf32>
    %cst = arith.constant 0.000000e+00 : f32
    %11 = vector.shape_cast %9 : vector<16x1xi1> to vector<16x1xi1>
    %12 = vector.broadcast %11 : vector<16x1xi1> to vector<16x256xi1>
    %13 = vector.broadcast %cst : f32 to vector<16x256xf32>
    %14 = arith.select %12, %10, %13 : vector<16x256xi1>, vector<16x256xf32>
    %15 = vector.extract_strided_slice %3 {offsets = [0, 0], sizes = [1, 256], strides = [1, 1]} : vector<4x256xf32> to vector<1x256xf32>
    %16 = vector.broadcast %15 : vector<1x256xf32> to vector<16x256xf32>
    %17 = arith.mulf %14, %16 : vector<16x256xf32>
    %18 = arith.addf %7, %17 : vector<16x256xf32>
    %c2_i32 = arith.constant 2 : i32
    %19 = vector.broadcast %c2_i32 : i32 to vector<16x1xi32>
    %20 = arith.cmpi sge, %4, %19 : vector<16x1xi32>
    %c2_i32_5 = arith.constant 2 : i32
    %21 = tpu.dynamic_rotate %2 by %c2_i32_5 dim 0 : vector<16x256xf32>, i32 -> vector<16x256xf32>
    %cst_6 = arith.constant 0.000000e+00 : f32
    %22 = vector.shape_cast %20 : vector<16x1xi1> to vector<16x1xi1>
    %23 = vector.broadcast %22 : vector<16x1xi1> to vector<16x256xi1>
    %24 = vector.broadcast %cst_6 : f32 to vector<16x256xf32>
    %25 = arith.select %23, %21, %24 : vector<16x256xi1>, vector<16x256xf32>
    %26 = vector.extract_strided_slice %3 {offsets = [1, 0], sizes = [1, 256], strides = [1, 1]} : vector<4x256xf32> to vector<1x256xf32>
    %27 = vector.broadcast %26 : vector<1x256xf32> to vector<16x256xf32>
    %28 = arith.mulf %25, %27 : vector<16x256xf32>
    %29 = arith.addf %18, %28 : vector<16x256xf32>
    %c1_i32 = arith.constant 1 : i32
    %30 = vector.broadcast %c1_i32 : i32 to vector<16x1xi32>
    %31 = arith.cmpi sge, %4, %30 : vector<16x1xi32>
    %c1_i32_7 = arith.constant 1 : i32
    %32 = tpu.dynamic_rotate %2 by %c1_i32_7 dim 0 : vector<16x256xf32>, i32 -> vector<16x256xf32>
    %cst_8 = arith.constant 0.000000e+00 : f32
    %33 = vector.shape_cast %31 : vector<16x1xi1> to vector<16x1xi1>
    %34 = vector.broadcast %33 : vector<16x1xi1> to vector<16x256xi1>
    %35 = vector.broadcast %cst_8 : f32 to vector<16x256xf32>
    %36 = arith.select %34, %32, %35 : vector<16x256xi1>, vector<16x256xf32>
    %37 = vector.extract_strided_slice %3 {offsets = [2, 0], sizes = [1, 256], strides = [1, 1]} : vector<4x256xf32> to vector<1x256xf32>
    %38 = vector.broadcast %37 : vector<1x256xf32> to vector<16x256xf32>
    %39 = arith.mulf %36, %38 : vector<16x256xf32>
    %40 = arith.addf %29, %39 : vector<16x256xf32>
    %c0_9 = arith.constant 0 : index
    %c0_10 = arith.constant 0 : index
    %41 = vector.load %arg3[%c0_9, %c0_10] : memref<1x256xf32, #tpu.memory_space<vmem>>, vector<1x256xf32>
    %42 = vector.broadcast %41 : vector<1x256xf32> to vector<16x256xf32>
    %43 = arith.addf %40, %42 : vector<16x256xf32>
    %cst_11 = arith.constant 0.000000e+00 : f32
    %44 = vector.broadcast %cst_11 : f32 to vector<16x256xf32>
    %45 = arith.subf %44, %43 : vector<16x256xf32>
    %46 = math.exp %45 : vector<16x256xf32>
    %cst_12 = arith.constant 1.000000e+00 : f32
    %47 = vector.broadcast %cst_12 : f32 to vector<16x256xf32>
    %48 = arith.addf %47, %46 : vector<16x256xf32>
    %cst_13 = arith.constant 1.000000e+00 : f32
    %49 = vector.broadcast %cst_13 : f32 to vector<16x256xf32>
    %50 = arith.divf %49, %48 : vector<16x256xf32>
    %51 = arith.mulf %43, %50 : vector<16x256xf32>
    %52 = vector.extract_strided_slice %51 {offsets = [0, 0], sizes = [16, 128], strides = [1, 1]} : vector<16x256xf32> to vector<16x128xf32>
    %53 = arith.truncf %52 : vector<16x128xf32> to vector<16x128xbf16>
    %c0_14 = arith.constant 0 : index
    %c0_15 = arith.constant 0 : index
    %c0_16 = arith.constant 0 : index
    %54 = vector.load %arg4[%c0_14, %c0_15, %c0_16] : memref<1x16x128xbf16, #tpu.memory_space<vmem>>, vector<1x16x128xbf16>
    %55 = vector.shape_cast %54 : vector<1x16x128xbf16> to vector<16x128xbf16>
    %56 = vector.shape_cast %53 : vector<16x128xbf16> to vector<1x16x128xbf16>
    tpu.vector_store %arg4[%c0_14, %c0_15, %c0_16], %56 {strides = array<i32>} : memref<1x16x128xbf16, #tpu.memory_space<vmem>>, vector<1x16x128xbf16>,
    %57 = vector.extract_strided_slice %51 {offsets = [0, 128], sizes = [16, 128], strides = [1, 1]} : vector<16x256xf32> to vector<16x128xf32>
    %58 = arith.truncf %57 : vector<16x128xf32> to vector<16x128xbf16>
    %c0_17 = arith.constant 0 : index
    %c0_18 = arith.constant 0 : index
    %c0_19 = arith.constant 0 : index
    %59 = vector.load %arg5[%c0_17, %c0_18, %c0_19] : memref<1x16x128xbf16, #tpu.memory_space<vmem>>, vector<1x16x128xbf16>
    %60 = vector.shape_cast %59 : vector<1x16x128xbf16> to vector<16x128xbf16>
    %61 = vector.shape_cast %58 : vector<16x128xbf16> to vector<1x16x128xbf16>
    tpu.vector_store %arg5[%c0_17, %c0_18, %c0_19], %61 {strides = array<i32>} : memref<1x16x128xbf16, #tpu.memory_space<vmem>>, vector<1x16x128xbf16>,
    return
  }
  func.func @transform_0(%arg0: i32) -> (i32, i32, i32) {
    %c0_i32 = arith.constant 0 : i32
    %c0_i32_0 = arith.constant 0 : i32
    %c0_i32_1 = arith.constant 0 : i32
    return %arg0, %c0_i32, %c0_i32_0 : i32, i32, i32
  }
  func.func @transform_1(%arg0: i32) -> (i32, i32) {
    %c0_i32 = arith.constant 0 : i32
    %c0_i32_0 = arith.constant 0 : i32
    %c0_i32_1 = arith.constant 0 : i32
    return %c0_i32, %c0_i32_0 : i32, i32
  }
  func.func @transform_2(%arg0: i32) -> (i32, i32) {
    %c0_i32 = arith.constant 0 : i32
    %c0_i32_0 = arith.constant 0 : i32
    %c0_i32_1 = arith.constant 0 : i32
    return %c0_i32, %c0_i32_0 : i32, i32
  }
  func.func @transform_3(%arg0: i32) -> (i32, i32, i32) {
    %c0_i32 = arith.constant 0 : i32
    %c0_i32_0 = arith.constant 0 : i32
    %c0_i32_1 = arith.constant 0 : i32
    return %arg0, %c0_i32, %c0_i32_0 : i32, i32, i32
  }
  func.func @transform_4(%arg0: i32) -> (i32, i32, i32) {
    %c0_i32 = arith.constant 0 : i32
    %c0_i32_0 = arith.constant 0 : i32
    %c0_i32_1 = arith.constant 0 : i32
    return %arg0, %c0_i32, %c0_i32_0 : i32, i32, i32
  }
}

module attributes {stable_mosaic.version = 11 : i64} {
  func.func @kernel(%arg0: i32, %arg1: memref<32x64xf32, #tpu.memory_space<vmem>>, %arg2: memref<64x388xbf16, #tpu.memory_space<vmem>>, %arg3: memref<32x128xbf16, #tpu.memory_space<vmem>>, %arg4: memref<32x256xbf16, #tpu.memory_space<vmem>>, %arg5: memref<32x4xf32, #tpu.memory_space<vmem>>) attributes {dimension_semantics = [#tpu.dimension_semantics<parallel>], iteration_bounds = array<i64: 1>, scalar_prefetch = 0 : i64, scratch_operands = 0 : i64, tpu.core_type = #tpu.core_type<tc>, window_params = [{transform_indices = @transform_0, window_bounds = array<i64: 32, 64>}, {pipeline_mode = #tpu.pipeline_mode<synchronous>, transform_indices = @transform_1, window_bounds = array<i64: 64, 388>}, {transform_indices = @transform_2, window_bounds = array<i64: 32, 128>}, {transform_indices = @transform_3, window_bounds = array<i64: 32, 256>}, {transform_indices = @transform_4, window_bounds = array<i64: 32, 4>}]} {
    %c0 = arith.constant 0 : index
    %c0_0 = arith.constant 0 : index
    %0 = vector.load %arg1[%c0, %c0_0] : memref<32x64xf32, #tpu.memory_space<vmem>>, vector<32x64xf32>
    %1 = arith.truncf %0 : vector<32x64xf32> to vector<32x64xbf16>
    %c0_1 = arith.constant 0 : index
    %c0_2 = arith.constant 0 : index
    %2 = vector.load %arg2[%c0_1, %c0_2] : memref<64x388xbf16, #tpu.memory_space<vmem>>, vector<64x388xbf16>
    %cst = arith.constant dense<0.000000e+00> : vector<32x388xf32>
    %3 = tpu.matmul %1, %2, %cst {dimension_numbers = #tpu.dot_dimension_numbers<[1], [0], [0], [1], [0, 0, 1, 1], [], []>} : vector<32x64xbf16>, vector<64x388xbf16>, vector<32x388xf32> -> vector<32x388xf32>
    %4 = vector.extract_strided_slice %3 {offsets = [0, 0], sizes = [32, 128], strides = [1, 1]} : vector<32x388xf32> to vector<32x128xf32>
    %5 = arith.truncf %4 : vector<32x128xf32> to vector<32x128xbf16>
    %c0_3 = arith.constant 0 : index
    %c0_4 = arith.constant 0 : index
    %6 = vector.load %arg3[%c0_3, %c0_4] : memref<32x128xbf16, #tpu.memory_space<vmem>>, vector<32x128xbf16>
    tpu.vector_store %arg3[%c0_3, %c0_4], %5 {strides = array<i32>} : memref<32x128xbf16, #tpu.memory_space<vmem>>, vector<32x128xbf16>,
    %7 = vector.extract_strided_slice %3 {offsets = [0, 128], sizes = [32, 256], strides = [1, 1]} : vector<32x388xf32> to vector<32x256xf32>
    %8 = arith.truncf %7 : vector<32x256xf32> to vector<32x256xbf16>
    %c0_5 = arith.constant 0 : index
    %c0_6 = arith.constant 0 : index
    %9 = vector.load %arg4[%c0_5, %c0_6] : memref<32x256xbf16, #tpu.memory_space<vmem>>, vector<32x256xbf16>
    tpu.vector_store %arg4[%c0_5, %c0_6], %8 {strides = array<i32>} : memref<32x256xbf16, #tpu.memory_space<vmem>>, vector<32x256xbf16>,
    %10 = vector.extract_strided_slice %3 {offsets = [0, 384], sizes = [32, 4], strides = [1, 1]} : vector<32x388xf32> to vector<32x4xf32>
    %c0_7 = arith.constant 0 : index
    %c0_8 = arith.constant 0 : index
    %11 = vector.load %arg5[%c0_7, %c0_8] : memref<32x4xf32, #tpu.memory_space<vmem>>, vector<32x4xf32>
    tpu.vector_store %arg5[%c0_7, %c0_8], %10 {strides = array<i32>} : memref<32x4xf32, #tpu.memory_space<vmem>>, vector<32x4xf32>,
    return
  }
  func.func @transform_0(%arg0: i32) -> (i32, i32) {
    %c0_i32 = arith.constant 0 : i32
    %c0_i32_0 = arith.constant 0 : i32
    return %arg0, %c0_i32 : i32, i32
  }
  func.func @transform_1(%arg0: i32) -> (i32, i32) {
    %c0_i32 = arith.constant 0 : i32
    %c0_i32_0 = arith.constant 0 : i32
    %c0_i32_1 = arith.constant 0 : i32
    return %c0_i32, %c0_i32_0 : i32, i32
  }
  func.func @transform_2(%arg0: i32) -> (i32, i32) {
    %c0_i32 = arith.constant 0 : i32
    %c0_i32_0 = arith.constant 0 : i32
    return %arg0, %c0_i32 : i32, i32
  }
  func.func @transform_3(%arg0: i32) -> (i32, i32) {
    %c0_i32 = arith.constant 0 : i32
    %c0_i32_0 = arith.constant 0 : i32
    return %arg0, %c0_i32 : i32, i32
  }
  func.func @transform_4(%arg0: i32) -> (i32, i32) {
    %c0_i32 = arith.constant 0 : i32
    %c0_i32_0 = arith.constant 0 : i32
    return %arg0, %c0_i32 : i32, i32
  }
}

module attributes {stable_mosaic.version = 11 : i64} {
  func.func @kernel(%arg0: i32, %arg1: memref<32x128xbf16, #tpu.memory_space<vmem>>, %arg2: memref<32x128xbf16, #tpu.memory_space<vmem>>, %arg3: memref<32x64xf32, #tpu.memory_space<vmem>>, %arg4: memref<1x128xf32, #tpu.memory_space<vmem>>, %arg5: memref<128x64xbf16, #tpu.memory_space<vmem>>, %arg6: memref<1x64xf32, #tpu.memory_space<vmem>>, %arg7: memref<1x64xf32, #tpu.memory_space<vmem>>, %arg8: memref<32x64xbf16, #tpu.memory_space<vmem>>) attributes {dimension_semantics = [#tpu.dimension_semantics<parallel>], iteration_bounds = array<i64: 1>, scalar_prefetch = 0 : i64, scratch_operands = 0 : i64, tpu.core_type = #tpu.core_type<tc>, window_params = [{transform_indices = @transform_0, window_bounds = array<i64: 32, 128>}, {transform_indices = @transform_1, window_bounds = array<i64: 32, 128>}, {transform_indices = @transform_2, window_bounds = array<i64: 32, 64>}, {pipeline_mode = #tpu.pipeline_mode<synchronous>, transform_indices = @transform_3, window_bounds = array<i64: 1, 128>}, {pipeline_mode = #tpu.pipeline_mode<synchronous>, transform_indices = @transform_4, window_bounds = array<i64: 128, 64>}, {pipeline_mode = #tpu.pipeline_mode<synchronous>, transform_indices = @transform_5, window_bounds = array<i64: 1, 64>}, {pipeline_mode = #tpu.pipeline_mode<synchronous>, transform_indices = @transform_6, window_bounds = array<i64: 1, 64>}, {transform_indices = @transform_7, window_bounds = array<i64: 32, 64>}]} {
    %c0 = arith.constant 0 : index
    %c0_0 = arith.constant 0 : index
    %0 = vector.load %arg1[%c0, %c0_0] : memref<32x128xbf16, #tpu.memory_space<vmem>>, vector<32x128xbf16>
    %1 = arith.extf %0 : vector<32x128xbf16> to vector<32x128xf32>
    %c0_1 = arith.constant 0 : index
    %c0_2 = arith.constant 0 : index
    %2 = vector.load %arg2[%c0_1, %c0_2] : memref<32x128xbf16, #tpu.memory_space<vmem>>, vector<32x128xbf16>
    %3 = arith.extf %2 : vector<32x128xbf16> to vector<32x128xf32>
    %cst = arith.constant 0.000000e+00 : f32
    %4 = vector.broadcast %cst : f32 to vector<32x128xf32>
    %5 = arith.subf %4, %3 : vector<32x128xf32>
    %6 = math.exp %5 : vector<32x128xf32>
    %cst_3 = arith.constant 1.000000e+00 : f32
    %7 = vector.broadcast %cst_3 : f32 to vector<32x128xf32>
    %8 = arith.addf %7, %6 : vector<32x128xf32>
    %cst_4 = arith.constant 1.000000e+00 : f32
    %9 = vector.broadcast %cst_4 : f32 to vector<32x128xf32>
    %10 = arith.divf %9, %8 : vector<32x128xf32>
    %11 = arith.mulf %3, %10 : vector<32x128xf32>
    %12 = arith.mulf %1, %11 : vector<32x128xf32>
    %13 = arith.mulf %12, %12 : vector<32x128xf32>
    %cst_5 = arith.constant dense<0.000000e+00> : vector<32xf32>
    %14 = vector.multi_reduction <add>, %13, %cst_5 [1] : vector<32x128xf32> to vector<32xf32>
    %15 = vector.shape_cast %14 : vector<32xf32> to vector<32x1xf32>
    %cst_6 = arith.constant 1.280000e+02 : f32
    %16 = vector.broadcast %cst_6 : f32 to vector<32x1xf32>
    %17 = arith.divf %15, %16 : vector<32x1xf32>
    %cst_7 = arith.constant 9.99999974E-6 : f32
    %18 = vector.broadcast %cst_7 : f32 to vector<32x1xf32>
    %19 = arith.addf %17, %18 : vector<32x1xf32>
    %20 = math.rsqrt %19 : vector<32x1xf32>
    %21 = vector.broadcast %20 : vector<32x1xf32> to vector<32x128xf32>
    %22 = arith.mulf %12, %21 : vector<32x128xf32>
    %c0_8 = arith.constant 0 : index
    %c0_9 = arith.constant 0 : index
    %23 = vector.load %arg4[%c0_8, %c0_9] : memref<1x128xf32, #tpu.memory_space<vmem>>, vector<1x128xf32>
    %24 = vector.broadcast %23 : vector<1x128xf32> to vector<32x128xf32>
    %25 = arith.mulf %22, %24 : vector<32x128xf32>
    %26 = arith.truncf %25 : vector<32x128xf32> to vector<32x128xbf16>
    %c0_10 = arith.constant 0 : index
    %c0_11 = arith.constant 0 : index
    %27 = vector.load %arg5[%c0_10, %c0_11] : memref<128x64xbf16, #tpu.memory_space<vmem>>, vector<128x64xbf16>
    %cst_12 = arith.constant dense<0.000000e+00> : vector<32x64xf32>
    %28 = tpu.matmul %26, %27, %cst_12 {dimension_numbers = #tpu.dot_dimension_numbers<[1], [0], [0], [1], [0, 0, 1, 1], [], []>} : vector<32x128xbf16>, vector<128x64xbf16>, vector<32x64xf32> -> vector<32x64xf32>
    %c0_13 = arith.constant 0 : index
    %c0_14 = arith.constant 0 : index
    %29 = vector.load %arg3[%c0_13, %c0_14] : memref<32x64xf32, #tpu.memory_space<vmem>>, vector<32x64xf32>
    %30 = arith.addf %28, %29 : vector<32x64xf32>
    %cst_15 = arith.constant dense<0.000000e+00> : vector<32xf32>
    %31 = vector.multi_reduction <add>, %30, %cst_15 [1] : vector<32x64xf32> to vector<32xf32>
    %32 = vector.shape_cast %31 : vector<32xf32> to vector<32x1xf32>
    %cst_16 = arith.constant 6.400000e+01 : f32
    %33 = vector.broadcast %cst_16 : f32 to vector<32x1xf32>
    %34 = arith.divf %32, %33 : vector<32x1xf32>
    %35 = vector.broadcast %34 : vector<32x1xf32> to vector<32x64xf32>
    %36 = arith.subf %30, %35 : vector<32x64xf32>
    %37 = arith.mulf %36, %36 : vector<32x64xf32>
    %cst_17 = arith.constant dense<0.000000e+00> : vector<32xf32>
    %38 = vector.multi_reduction <add>, %37, %cst_17 [1] : vector<32x64xf32> to vector<32xf32>
    %39 = vector.shape_cast %38 : vector<32xf32> to vector<32x1xf32>
    %cst_18 = arith.constant 6.400000e+01 : f32
    %40 = vector.broadcast %cst_18 : f32 to vector<32x1xf32>
    %41 = arith.divf %39, %40 : vector<32x1xf32>
    %cst_19 = arith.constant 9.99999974E-6 : f32
    %42 = vector.broadcast %cst_19 : f32 to vector<32x1xf32>
    %43 = arith.addf %41, %42 : vector<32x1xf32>
    %44 = math.rsqrt %43 : vector<32x1xf32>
    %45 = vector.broadcast %44 : vector<32x1xf32> to vector<32x64xf32>
    %46 = arith.mulf %36, %45 : vector<32x64xf32>
    %c0_20 = arith.constant 0 : index
    %c0_21 = arith.constant 0 : index
    %47 = vector.load %arg6[%c0_20, %c0_21] : memref<1x64xf32, #tpu.memory_space<vmem>>, vector<1x64xf32>
    %48 = vector.broadcast %47 : vector<1x64xf32> to vector<32x64xf32>
    %49 = arith.mulf %46, %48 : vector<32x64xf32>
    %c0_22 = arith.constant 0 : index
    %c0_23 = arith.constant 0 : index
    %50 = vector.load %arg7[%c0_22, %c0_23] : memref<1x64xf32, #tpu.memory_space<vmem>>, vector<1x64xf32>
    %51 = vector.broadcast %50 : vector<1x64xf32> to vector<32x64xf32>
    %52 = arith.addf %49, %51 : vector<32x64xf32>
    %53 = arith.truncf %52 : vector<32x64xf32> to vector<32x64xbf16>
    %c0_24 = arith.constant 0 : index
    %c0_25 = arith.constant 0 : index
    %54 = vector.load %arg8[%c0_24, %c0_25] : memref<32x64xbf16, #tpu.memory_space<vmem>>, vector<32x64xbf16>
    tpu.vector_store %arg8[%c0_24, %c0_25], %53 {strides = array<i32>} : memref<32x64xbf16, #tpu.memory_space<vmem>>, vector<32x64xbf16>,
    return
  }
  func.func @transform_0(%arg0: i32) -> (i32, i32) {
    %c0_i32 = arith.constant 0 : i32
    %c0_i32_0 = arith.constant 0 : i32
    return %arg0, %c0_i32 : i32, i32
  }
  func.func @transform_1(%arg0: i32) -> (i32, i32) {
    %c0_i32 = arith.constant 0 : i32
    %c0_i32_0 = arith.constant 0 : i32
    return %arg0, %c0_i32 : i32, i32
  }
  func.func @transform_2(%arg0: i32) -> (i32, i32) {
    %c0_i32 = arith.constant 0 : i32
    %c0_i32_0 = arith.constant 0 : i32
    return %arg0, %c0_i32 : i32, i32
  }
  func.func @transform_3(%arg0: i32) -> (i32, i32) {
    %c0_i32 = arith.constant 0 : i32
    %c0_i32_0 = arith.constant 0 : i32
    %c0_i32_1 = arith.constant 0 : i32
    return %c0_i32, %c0_i32_0 : i32, i32
  }
  func.func @transform_4(%arg0: i32) -> (i32, i32) {
    %c0_i32 = arith.constant 0 : i32
    %c0_i32_0 = arith.constant 0 : i32
    %c0_i32_1 = arith.constant 0 : i32
    return %c0_i32, %c0_i32_0 : i32, i32
  }
  func.func @transform_5(%arg0: i32) -> (i32, i32) {
    %c0_i32 = arith.constant 0 : i32
    %c0_i32_0 = arith.constant 0 : i32
    %c0_i32_1 = arith.constant 0 : i32
    return %c0_i32, %c0_i32_0 : i32, i32
  }
  func.func @transform_6(%arg0: i32) -> (i32, i32) {
    %c0_i32 = arith.constant 0 : i32
    %c0_i32_0 = arith.constant 0 : i32
    %c0_i32_1 = arith.constant 0 : i32
    return %c0_i32, %c0_i32_0 : i32, i32
  }
  func.func @transform_7(%arg0: i32) -> (i32, i32) {
    %c0_i32 = arith.constant 0 : i32
    %c0_i32_0 = arith.constant 0 : i32
    return %arg0, %c0_i32 : i32, i32
  }
}

module attributes {stable_mosaic.version = 11 : i64} {
  func.func @kernel(%arg0: i32, %arg1: i32, %arg2: memref<1x16x128xbf16, #tpu.memory_space<vmem>>, %arg3: memref<1x16x4xf32, #tpu.memory_space<vmem>>, %arg4: memref<1x16x128xbf16, #tpu.memory_space<vmem>>, %arg5: memref<1x4xf32, #tpu.memory_space<vmem>>, %arg6: memref<1x4xf32, #tpu.memory_space<vmem>>, %arg7: memref<1x128xf32, #tpu.memory_space<vmem>>, %arg8: memref<1x16x128xbf16, #tpu.memory_space<vmem>>, %arg9: memref<64x128xf32, #tpu.memory_space<vmem>>) attributes {dimension_semantics = [#tpu.dimension_semantics<parallel>, #tpu.dimension_semantics<arbitrary>], iteration_bounds = array<i64: 2, 1>, scalar_prefetch = 0 : i64, scratch_operands = 1 : i64, tpu.core_type = #tpu.core_type<tc>, window_params = [{transform_indices = @transform_0, window_bounds = array<i64: 1, 16, 128>}, {transform_indices = @transform_1, window_bounds = array<i64: 1, 16, 4>}, {transform_indices = @transform_2, window_bounds = array<i64: 1, 16, 128>}, {pipeline_mode = #tpu.pipeline_mode<synchronous>, transform_indices = @transform_3, window_bounds = array<i64: 1, 4>}, {pipeline_mode = #tpu.pipeline_mode<synchronous>, transform_indices = @transform_4, window_bounds = array<i64: 1, 4>}, {pipeline_mode = #tpu.pipeline_mode<synchronous>, transform_indices = @transform_5, window_bounds = array<i64: 1, 128>}, {transform_indices = @transform_6, window_bounds = array<i64: 1, 16, 128>}]} {
    %c0_i32 = arith.constant 0 : i32
    %0 = arith.cmpi eq, %arg1, %c0_i32 : i32
    %1 = arith.extui %0 : i1 to i32
    %c0_i32_0 = arith.constant 0 : i32
    %2 = arith.cmpi ne, %1, %c0_i32_0 : i32
    scf.if %2 {
      %cst_31 = arith.constant 0.000000e+00 : f32
      %91 = vector.broadcast %cst_31 : f32 to vector<64x128xf32>
      %c0_32 = arith.constant 0 : index
      %c0_33 = arith.constant 0 : index
      %92 = vector.load %arg9[%c0_32, %c0_33] : memref<64x128xf32, #tpu.memory_space<vmem>>, vector<64x128xf32>
      tpu.vector_store %arg9[%c0_32, %c0_33], %91 {strides = array<i32>} : memref<64x128xf32, #tpu.memory_space<vmem>>, vector<64x128xf32>,
    } else {
    }
    %c0 = arith.constant 0 : index
    %c0_1 = arith.constant 0 : index
    %c0_2 = arith.constant 0 : index
    %3 = vector.load %arg2[%c0, %c0_1, %c0_2] : memref<1x16x128xbf16, #tpu.memory_space<vmem>>, vector<1x16x128xbf16>
    %4 = vector.shape_cast %3 : vector<1x16x128xbf16> to vector<16x128xbf16>
    %5 = arith.extf %4 : vector<16x128xbf16> to vector<16x128xf32>
    %c0_3 = arith.constant 0 : index
    %c0_4 = arith.constant 0 : index
    %c0_5 = arith.constant 0 : index
    %6 = vector.load %arg4[%c0_3, %c0_4, %c0_5] : memref<1x16x128xbf16, #tpu.memory_space<vmem>>, vector<1x16x128xbf16>
    %7 = vector.shape_cast %6 : vector<1x16x128xbf16> to vector<16x128xbf16>
    %8 = vector.extract_strided_slice %7 {offsets = [0, 0], sizes = [16, 64], strides = [1, 1]} : vector<16x128xbf16> to vector<16x64xbf16>
    %9 = vector.extract_strided_slice %7 {offsets = [0, 64], sizes = [16, 64], strides = [1, 1]} : vector<16x128xbf16> to vector<16x64xbf16>
    %c0_6 = arith.constant 0 : index
    %c0_7 = arith.constant 0 : index
    %10 = vector.load %arg5[%c0_6, %c0_7] : memref<1x4xf32, #tpu.memory_space<vmem>>, vector<1x4xf32>
    %11 = math.exp %10 : vector<1x4xf32>
    %cst = arith.constant 0.000000e+00 : f32
    %12 = vector.broadcast %cst : f32 to vector<1x4xf32>
    %13 = arith.subf %12, %11 : vector<1x4xf32>
    %c0_8 = arith.constant 0 : index
    %c0_9 = arith.constant 0 : index
    %c0_10 = arith.constant 0 : index
    %14 = vector.load %arg3[%c0_8, %c0_9, %c0_10] : memref<1x16x4xf32, #tpu.memory_space<vmem>>, vector<1x16x4xf32>
    %15 = vector.shape_cast %14 : vector<1x16x4xf32> to vector<16x4xf32>
    %c0_11 = arith.constant 0 : index
    %c0_12 = arith.constant 0 : index
    %16 = vector.load %arg6[%c0_11, %c0_12] : memref<1x4xf32, #tpu.memory_space<vmem>>, vector<1x4xf32>
    %17 = vector.broadcast %16 : vector<1x4xf32> to vector<16x4xf32>
    %18 = arith.addf %15, %17 : vector<16x4xf32>
    %cst_13 = arith.constant 0.000000e+00 : f32
    %19 = vector.broadcast %cst_13 : f32 to vector<16x4xf32>
    %20 = arith.maximumf %18, %19 : vector<16x4xf32>
    %21 = math.absf %18 : vector<16x4xf32>
    %cst_14 = arith.constant 0.000000e+00 : f32
    %22 = vector.broadcast %cst_14 : f32 to vector<16x4xf32>
    %23 = arith.subf %22, %21 : vector<16x4xf32>
    %24 = math.exp %23 : vector<16x4xf32>
    %cst_15 = arith.constant 1.000000e+00 : f32
    %25 = vector.broadcast %cst_15 : f32 to vector<16x4xf32>
    %26 = arith.addf %25, %24 : vector<16x4xf32>
    %27 = math.log %26 : vector<16x4xf32>
    %28 = arith.addf %20, %27 : vector<16x4xf32>
    %29 = vector.broadcast %13 : vector<1x4xf32> to vector<16x4xf32>
    %30 = arith.mulf %28, %29 : vector<16x4xf32>
    %31 = tpu.iota {dimensions = array<i32: 0>} : vector<16x16xi32>
    %32 = tpu.iota {dimensions = array<i32: 1>} : vector<16x16xi32>
    %33 = arith.cmpi sle, %32, %31 : vector<16x16xi32>
    %34 = arith.extui %33 : vector<16x16xi1> to vector<16x16xi32>
    %35 = arith.sitofp %34 : vector<16x16xi32> to vector<16x16xf32>
    %cst_16 = arith.constant dense<0.000000e+00> : vector<16x4xf32>
    %36 = tpu.matmul %35, %30, %cst_16 {dimension_numbers = #tpu.dot_dimension_numbers<[1], [0], [0], [1], [0, 0, 1, 1], [], []>} : vector<16x16xf32>, vector<16x4xf32>, vector<16x4xf32> -> vector<16x4xf32>
    %37 = math.exp %36 : vector<16x4xf32>
    %38 = vector.extract_strided_slice %37 {offsets = [0, 0], sizes = [16, 1], strides = [1, 1]} : vector<16x4xf32> to vector<16x1xf32>
    %39 = vector.shape_cast %38 : vector<16x1xf32> to vector<16x1xf32>
    %40 = vector.broadcast %39 : vector<16x1xf32> to vector<16x32xf32>
    %41 = vector.extract_strided_slice %37 {offsets = [0, 1], sizes = [16, 1], strides = [1, 1]} : vector<16x4xf32> to vector<16x1xf32>
    %42 = vector.shape_cast %41 : vector<16x1xf32> to vector<16x1xf32>
    %43 = vector.broadcast %42 : vector<16x1xf32> to vector<16x32xf32>
    %44 = vector.extract_strided_slice %37 {offsets = [0, 2], sizes = [16, 1], strides = [1, 1]} : vector<16x4xf32> to vector<16x1xf32>
    %45 = vector.shape_cast %44 : vector<16x1xf32> to vector<16x1xf32>
    %46 = vector.broadcast %45 : vector<16x1xf32> to vector<16x32xf32>
    %47 = vector.extract_strided_slice %37 {offsets = [0, 3], sizes = [16, 1], strides = [1, 1]} : vector<16x4xf32> to vector<16x1xf32>
    %48 = vector.shape_cast %47 : vector<16x1xf32> to vector<16x1xf32>
    %49 = vector.broadcast %48 : vector<16x1xf32> to vector<16x32xf32>
    %50 = tpu.concatenate %40, %43, %46, %49 in 1 : vector<16x32xf32>, vector<16x32xf32>, vector<16x32xf32>, vector<16x32xf32> -> vector<16x128xf32>
    %cst_17 = arith.constant 0.000000e+00 : f32
    %51 = vector.broadcast %cst_17 : f32 to vector<16x4xf32>
    %52 = arith.subf %51, %36 : vector<16x4xf32>
    %53 = math.exp %52 : vector<16x4xf32>
    %54 = arith.mulf %53, %28 : vector<16x4xf32>
    %55 = vector.extract_strided_slice %54 {offsets = [0, 0], sizes = [16, 1], strides = [1, 1]} : vector<16x4xf32> to vector<16x1xf32>
    %56 = vector.shape_cast %55 : vector<16x1xf32> to vector<16x1xf32>
    %57 = vector.broadcast %56 : vector<16x1xf32> to vector<16x32xf32>
    %58 = vector.extract_strided_slice %54 {offsets = [0, 1], sizes = [16, 1], strides = [1, 1]} : vector<16x4xf32> to vector<16x1xf32>
    %59 = vector.shape_cast %58 : vector<16x1xf32> to vector<16x1xf32>
    %60 = vector.broadcast %59 : vector<16x1xf32> to vector<16x32xf32>
    %61 = vector.extract_strided_slice %54 {offsets = [0, 2], sizes = [16, 1], strides = [1, 1]} : vector<16x4xf32> to vector<16x1xf32>
    %62 = vector.shape_cast %61 : vector<16x1xf32> to vector<16x1xf32>
    %63 = vector.broadcast %62 : vector<16x1xf32> to vector<16x32xf32>
    %64 = vector.extract_strided_slice %54 {offsets = [0, 3], sizes = [16, 1], strides = [1, 1]} : vector<16x4xf32> to vector<16x1xf32>
    %65 = vector.shape_cast %64 : vector<16x1xf32> to vector<16x1xf32>
    %66 = vector.broadcast %65 : vector<16x1xf32> to vector<16x32xf32>
    %67 = tpu.concatenate %57, %60, %63, %66 in 1 : vector<16x32xf32>, vector<16x32xf32>, vector<16x32xf32>, vector<16x32xf32> -> vector<16x128xf32>
    %68 = arith.mulf %67, %5 : vector<16x128xf32>
    %69 = arith.truncf %68 : vector<16x128xf32> to vector<16x128xbf16>
    %cst_18 = arith.constant dense<0.000000e+00> : vector<16x16xf32>
    %70 = tpu.matmul %9, %8, %cst_18 {dimension_numbers = #tpu.dot_dimension_numbers<[1], [1], [0], [0], [0, 0, 1, 0], [], []>} : vector<16x64xbf16>, vector<16x64xbf16>, vector<16x16xf32> -> vector<16x16xf32>
    %cst_19 = arith.constant 0.000000e+00 : f32
    %71 = vector.broadcast %cst_19 : f32 to vector<16x16xf32>
    %72 = arith.select %33, %70, %71 : vector<16x16xi1>, vector<16x16xf32>
    %73 = arith.truncf %72 : vector<16x16xf32> to vector<16x16xbf16>
    %cst_20 = arith.constant dense<0.000000e+00> : vector<16x128xf32>
    %74 = tpu.matmul %73, %69, %cst_20 {dimension_numbers = #tpu.dot_dimension_numbers<[1], [0], [0], [1], [0, 0, 1, 1], [], []>} : vector<16x16xbf16>, vector<16x128xbf16>, vector<16x128xf32> -> vector<16x128xf32>
    %c0_21 = arith.constant 0 : index
    %c0_22 = arith.constant 0 : index
    %75 = vector.load %arg9[%c0_21, %c0_22] : memref<64x128xf32, #tpu.memory_space<vmem>>, vector<64x128xf32>
    %76 = arith.truncf %75 : vector<64x128xf32> to vector<64x128xbf16>
    %cst_23 = arith.constant dense<0.000000e+00> : vector<16x128xf32>
    %77 = tpu.matmul %9, %76, %cst_23 {dimension_numbers = #tpu.dot_dimension_numbers<[1], [0], [0], [1], [0, 0, 1, 1], [], []>} : vector<16x64xbf16>, vector<64x128xbf16>, vector<16x128xf32> -> vector<16x128xf32>
    %78 = arith.addf %74, %77 : vector<16x128xf32>
    %79 = arith.mulf %50, %78 : vector<16x128xf32>
    %c0_24 = arith.constant 0 : index
    %c0_25 = arith.constant 0 : index
    %80 = vector.load %arg7[%c0_24, %c0_25] : memref<1x128xf32, #tpu.memory_space<vmem>>, vector<1x128xf32>
    %81 = vector.broadcast %80 : vector<1x128xf32> to vector<16x128xf32>
    %82 = arith.mulf %81, %5 : vector<16x128xf32>
    %83 = arith.addf %79, %82 : vector<16x128xf32>
    %84 = arith.truncf %83 : vector<16x128xf32> to vector<16x128xbf16>
    %c0_26 = arith.constant 0 : index
    %c0_27 = arith.constant 0 : index
    %c0_28 = arith.constant 0 : index
    %85 = vector.load %arg8[%c0_26, %c0_27, %c0_28] : memref<1x16x128xbf16, #tpu.memory_space<vmem>>, vector<1x16x128xbf16>
    %86 = vector.shape_cast %85 : vector<1x16x128xbf16> to vector<16x128xbf16>
    %87 = vector.shape_cast %84 : vector<16x128xbf16> to vector<1x16x128xbf16>
    tpu.vector_store %arg8[%c0_26, %c0_27, %c0_28], %87 {strides = array<i32>} : memref<1x16x128xbf16, #tpu.memory_space<vmem>>, vector<1x16x128xbf16>,
    %c0_i32_29 = arith.constant 0 : i32
    %88 = arith.cmpi slt, %arg1, %c0_i32_29 : i32
    %89 = arith.extui %88 : i1 to i32
    %c0_i32_30 = arith.constant 0 : i32
    %90 = arith.cmpi ne, %89, %c0_i32_30 : i32
    scf.if %90 {
      %c0_31 = arith.constant 0 : index
      %c0_32 = arith.constant 0 : index
      %91 = vector.load %arg9[%c0_31, %c0_32] : memref<64x128xf32, #tpu.memory_space<vmem>>, vector<64x128xf32>
      %cst_33 = arith.constant dense<0.000000e+00> : vector<64x128xf32>
      %92 = tpu.matmul %8, %69, %cst_33 {dimension_numbers = #tpu.dot_dimension_numbers<[0], [0], [1], [1], [0, 1, 1, 1], [], []>} : vector<16x64xbf16>, vector<16x128xbf16>, vector<64x128xf32> -> vector<64x128xf32>
      %93 = arith.addf %91, %92 : vector<64x128xf32>
      %94 = vector.extract_strided_slice %50 {offsets = [15, 0], sizes = [1, 128], strides = [1, 1]} : vector<16x128xf32> to vector<1x128xf32>
      %95 = vector.broadcast %94 : vector<1x128xf32> to vector<64x128xf32>
      %96 = arith.mulf %95, %93 : vector<64x128xf32>
      %c0_34 = arith.constant 0 : index
      %c0_35 = arith.constant 0 : index
      %97 = vector.load %arg9[%c0_34, %c0_35] : memref<64x128xf32, #tpu.memory_space<vmem>>, vector<64x128xf32>
      tpu.vector_store %arg9[%c0_34, %c0_35], %96 {strides = array<i32>} : memref<64x128xf32, #tpu.memory_space<vmem>>, vector<64x128xf32>,
    } else {
    }
    return
  }
  func.func @transform_0(%arg0: i32, %arg1: i32) -> (i32, i32, i32) {
    %c0_i32 = arith.constant 0 : i32
    %c0_i32_0 = arith.constant 0 : i32
    return %arg0, %arg1, %c0_i32 : i32, i32, i32
  }
  func.func @transform_1(%arg0: i32, %arg1: i32) -> (i32, i32, i32) {
    %c0_i32 = arith.constant 0 : i32
    %c0_i32_0 = arith.constant 0 : i32
    return %arg0, %arg1, %c0_i32 : i32, i32, i32
  }
  func.func @transform_2(%arg0: i32, %arg1: i32) -> (i32, i32, i32) {
    %c0_i32 = arith.constant 0 : i32
    %c0_i32_0 = arith.constant 0 : i32
    return %arg0, %arg1, %c0_i32 : i32, i32, i32
  }
  func.func @transform_3(%arg0: i32, %arg1: i32) -> (i32, i32) {
    %c0_i32 = arith.constant 0 : i32
    %c0_i32_0 = arith.constant 0 : i32
    %c0_i32_1 = arith.constant 0 : i32
    return %c0_i32, %c0_i32_0 : i32, i32
  }
  func.func @transform_4(%arg0: i32, %arg1: i32) -> (i32, i32) {
    %c0_i32 = arith.constant 0 : i32
    %c0_i32_0 = arith.constant 0 : i32
    %c0_i32_1 = arith.constant 0 : i32
    return %c0_i32, %c0_i32_0 : i32, i32
  }
  func.func @transform_5(%arg0: i32, %arg1: i32) -> (i32, i32) {
    %c0_i32 = arith.constant 0 : i32
    %c0_i32_0 = arith.constant 0 : i32
    %c0_i32_1 = arith.constant 0 : i32
    return %c0_i32, %c0_i32_0 : i32, i32
  }
  func.func @transform_6(%arg0: i32, %arg1: i32) -> (i32, i32, i32) {
    %c0_i32 = arith.constant 0 : i32
    %c0_i32_0 = arith.constant 0 : i32
    return %arg0, %arg1, %c0_i32 : i32, i32, i32
  }
}

module attributes {stable_mosaic.version = 11 : i64} {
  func.func @kernel(%arg0: i32, %arg1: i32, %arg2: memref<32x64xbf16, #tpu.memory_space<vmem>>, %arg3: memref<64x256xbf16, #tpu.memory_space<vmem>>, %arg4: memref<1x256xf32, #tpu.memory_space<vmem>>, %arg5: memref<64x256xbf16, #tpu.memory_space<vmem>>, %arg6: memref<1x256xf32, #tpu.memory_space<vmem>>, %arg7: memref<256x64xbf16, #tpu.memory_space<vmem>>, %arg8: memref<1x64xf32, #tpu.memory_space<vmem>>, %arg9: memref<1x64xf32, #tpu.memory_space<vmem>>, %arg10: memref<1x64xf32, #tpu.memory_space<vmem>>, %arg11: memref<32x64xf32, #tpu.memory_space<vmem>>, %arg12: memref<32x64xf32, #tpu.memory_space<vmem>>) attributes {dimension_semantics = [#tpu.dimension_semantics<parallel>, #tpu.dimension_semantics<arbitrary>], iteration_bounds = array<i64: 1, 1>, scalar_prefetch = 0 : i64, scratch_operands = 1 : i64, tpu.core_type = #tpu.core_type<tc>, window_params = [{transform_indices = @transform_0, window_bounds = array<i64: 32, 64>}, {transform_indices = @transform_1, window_bounds = array<i64: 64, 256>}, {transform_indices = @transform_2, window_bounds = array<i64: 1, 256>}, {transform_indices = @transform_3, window_bounds = array<i64: 64, 256>}, {transform_indices = @transform_4, window_bounds = array<i64: 1, 256>}, {transform_indices = @transform_5, window_bounds = array<i64: 256, 64>}, {pipeline_mode = #tpu.pipeline_mode<synchronous>, transform_indices = @transform_6, window_bounds = array<i64: 1, 64>}, {pipeline_mode = #tpu.pipeline_mode<synchronous>, transform_indices = @transform_7, window_bounds = array<i64: 1, 64>}, {pipeline_mode = #tpu.pipeline_mode<synchronous>, transform_indices = @transform_8, window_bounds = array<i64: 1, 64>}, {transform_indices = @transform_9, window_bounds = array<i64: 32, 64>}]} {
    %c0_i32 = arith.constant 0 : i32
    %0 = arith.cmpi eq, %arg1, %c0_i32 : i32
    %1 = arith.extui %0 : i1 to i32
    %c0_i32_0 = arith.constant 0 : i32
    %2 = arith.cmpi ne, %1, %c0_i32_0 : i32
    scf.if %2 {
      %cst_24 = arith.constant 0.000000e+00 : f32
      %37 = vector.broadcast %cst_24 : f32 to vector<32x64xf32>
      %c0_25 = arith.constant 0 : index
      %c0_26 = arith.constant 0 : index
      %38 = vector.load %arg12[%c0_25, %c0_26] : memref<32x64xf32, #tpu.memory_space<vmem>>, vector<32x64xf32>
      tpu.vector_store %arg12[%c0_25, %c0_26], %37 {strides = array<i32>} : memref<32x64xf32, #tpu.memory_space<vmem>>, vector<32x64xf32>,
    } else {
    }
    %c0 = arith.constant 0 : index
    %c0_1 = arith.constant 0 : index
    %3 = vector.load %arg2[%c0, %c0_1] : memref<32x64xbf16, #tpu.memory_space<vmem>>, vector<32x64xbf16>
    %c0_2 = arith.constant 0 : index
    %c0_3 = arith.constant 0 : index
    %4 = vector.load %arg3[%c0_2, %c0_3] : memref<64x256xbf16, #tpu.memory_space<vmem>>, vector<64x256xbf16>
    %cst = arith.constant dense<0.000000e+00> : vector<32x256xf32>
    %5 = tpu.matmul %3, %4, %cst {dimension_numbers = #tpu.dot_dimension_numbers<[1], [0], [0], [1], [0, 0, 1, 1], [], []>} : vector<32x64xbf16>, vector<64x256xbf16>, vector<32x256xf32> -> vector<32x256xf32>
    %c0_4 = arith.constant 0 : index
    %c0_5 = arith.constant 0 : index
    %6 = vector.load %arg4[%c0_4, %c0_5] : memref<1x256xf32, #tpu.memory_space<vmem>>, vector<1x256xf32>
    %7 = vector.broadcast %6 : vector<1x256xf32> to vector<32x256xf32>
    %8 = arith.addf %5, %7 : vector<32x256xf32>
    %c0_6 = arith.constant 0 : index
    %c0_7 = arith.constant 0 : index
    %9 = vector.load %arg5[%c0_6, %c0_7] : memref<64x256xbf16, #tpu.memory_space<vmem>>, vector<64x256xbf16>
    %cst_8 = arith.constant dense<0.000000e+00> : vector<32x256xf32>
    %10 = tpu.matmul %3, %9, %cst_8 {dimension_numbers = #tpu.dot_dimension_numbers<[1], [0], [0], [1], [0, 0, 1, 1], [], []>} : vector<32x64xbf16>, vector<64x256xbf16>, vector<32x256xf32> -> vector<32x256xf32>
    %c0_9 = arith.constant 0 : index
    %c0_10 = arith.constant 0 : index
    %11 = vector.load %arg6[%c0_9, %c0_10] : memref<1x256xf32, #tpu.memory_space<vmem>>, vector<1x256xf32>
    %12 = vector.broadcast %11 : vector<1x256xf32> to vector<32x256xf32>
    %13 = arith.addf %10, %12 : vector<32x256xf32>
    %cst_11 = arith.constant 5.000000e-01 : f32
    %14 = vector.broadcast %cst_11 : f32 to vector<32x256xf32>
    %15 = arith.mulf %14, %8 : vector<32x256xf32>
    %cst_12 = arith.constant 4.471500e-02 : f32
    %16 = vector.broadcast %cst_12 : f32 to vector<32x256xf32>
    %17 = arith.mulf %16, %8 : vector<32x256xf32>
    %18 = arith.mulf %17, %8 : vector<32x256xf32>
    %19 = arith.mulf %18, %8 : vector<32x256xf32>
    %20 = arith.addf %8, %19 : vector<32x256xf32>
    %cst_13 = arith.constant 0.797884583 : f32
    %21 = vector.broadcast %cst_13 : f32 to vector<32x256xf32>
    %22 = arith.mulf %21, %20 : vector<32x256xf32>
    %23 = math.tanh %22 : vector<32x256xf32>
    %cst_14 = arith.constant 1.000000e+00 : f32
    %24 = vector.broadcast %cst_14 : f32 to vector<32x256xf32>
    %25 = arith.addf %24, %23 : vector<32x256xf32>
    %26 = arith.mulf %15, %25 : vector<32x256xf32>
    %27 = arith.mulf %26, %13 : vector<32x256xf32>
    %c0_15 = arith.constant 0 : index
    %c0_16 = arith.constant 0 : index
    %28 = vector.load %arg12[%c0_15, %c0_16] : memref<32x64xf32, #tpu.memory_space<vmem>>, vector<32x64xf32>
    %29 = arith.truncf %27 : vector<32x256xf32> to vector<32x256xbf16>
    %c0_17 = arith.constant 0 : index
    %c0_18 = arith.constant 0 : index
    %30 = vector.load %arg7[%c0_17, %c0_18] : memref<256x64xbf16, #tpu.memory_space<vmem>>, vector<256x64xbf16>
    %cst_19 = arith.constant dense<0.000000e+00> : vector<32x64xf32>
    %31 = tpu.matmul %29, %30, %cst_19 {dimension_numbers = #tpu.dot_dimension_numbers<[1], [0], [0], [1], [0, 0, 1, 1], [], []>} : vector<32x256xbf16>, vector<256x64xbf16>, vector<32x64xf32> -> vector<32x64xf32>
    %32 = arith.addf %28, %31 : vector<32x64xf32>
    %c0_20 = arith.constant 0 : index
    %c0_21 = arith.constant 0 : index
    %33 = vector.load %arg12[%c0_20, %c0_21] : memref<32x64xf32, #tpu.memory_space<vmem>>, vector<32x64xf32>
    tpu.vector_store %arg12[%c0_20, %c0_21], %32 {strides = array<i32>} : memref<32x64xf32, #tpu.memory_space<vmem>>, vector<32x64xf32>,
    %c0_i32_22 = arith.constant 0 : i32
    %34 = arith.cmpi eq, %arg1, %c0_i32_22 : i32
    %35 = arith.extui %34 : i1 to i32
    %c0_i32_23 = arith.constant 0 : i32
    %36 = arith.cmpi ne, %35, %c0_i32_23 : i32
    scf.if %36 {
      %c0_24 = arith.constant 0 : index
      %c0_25 = arith.constant 0 : index
      %37 = vector.load %arg12[%c0_24, %c0_25] : memref<32x64xf32, #tpu.memory_space<vmem>>, vector<32x64xf32>
      %c0_26 = arith.constant 0 : index
      %c0_27 = arith.constant 0 : index
      %38 = vector.load %arg8[%c0_26, %c0_27] : memref<1x64xf32, #tpu.memory_space<vmem>>, vector<1x64xf32>
      %39 = vector.broadcast %38 : vector<1x64xf32> to vector<32x64xf32>
      %40 = arith.addf %37, %39 : vector<32x64xf32>
      %c0_28 = arith.constant 0 : index
      %c0_29 = arith.constant 0 : index
      %41 = vector.load %arg2[%c0_28, %c0_29] : memref<32x64xbf16, #tpu.memory_space<vmem>>, vector<32x64xbf16>
      %42 = arith.extf %41 : vector<32x64xbf16> to vector<32x64xf32>
      %43 = arith.addf %40, %42 : vector<32x64xf32>
      %cst_30 = arith.constant dense<0.000000e+00> : vector<32xf32>
      %44 = vector.multi_reduction <add>, %43, %cst_30 [1] : vector<32x64xf32> to vector<32xf32>
      %45 = vector.shape_cast %44 : vector<32xf32> to vector<32x1xf32>
      %cst_31 = arith.constant 6.400000e+01 : f32
      %46 = vector.broadcast %cst_31 : f32 to vector<32x1xf32>
      %47 = arith.divf %45, %46 : vector<32x1xf32>
      %48 = vector.broadcast %47 : vector<32x1xf32> to vector<32x64xf32>
      %49 = arith.subf %43, %48 : vector<32x64xf32>
      %50 = arith.mulf %49, %49 : vector<32x64xf32>
      %cst_32 = arith.constant dense<0.000000e+00> : vector<32xf32>
      %51 = vector.multi_reduction <add>, %50, %cst_32 [1] : vector<32x64xf32> to vector<32xf32>
      %52 = vector.shape_cast %51 : vector<32xf32> to vector<32x1xf32>
      %cst_33 = arith.constant 6.400000e+01 : f32
      %53 = vector.broadcast %cst_33 : f32 to vector<32x1xf32>
      %54 = arith.divf %52, %53 : vector<32x1xf32>
      %cst_34 = arith.constant 9.99999974E-6 : f32
      %55 = vector.broadcast %cst_34 : f32 to vector<32x1xf32>
      %56 = arith.addf %54, %55 : vector<32x1xf32>
      %57 = math.rsqrt %56 : vector<32x1xf32>
      %58 = vector.broadcast %57 : vector<32x1xf32> to vector<32x64xf32>
      %59 = arith.mulf %49, %58 : vector<32x64xf32>
      %c0_35 = arith.constant 0 : index
      %c0_36 = arith.constant 0 : index
      %60 = vector.load %arg9[%c0_35, %c0_36] : memref<1x64xf32, #tpu.memory_space<vmem>>, vector<1x64xf32>
      %61 = vector.broadcast %60 : vector<1x64xf32> to vector<32x64xf32>
      %62 = arith.mulf %59, %61 : vector<32x64xf32>
      %c0_37 = arith.constant 0 : index
      %c0_38 = arith.constant 0 : index
      %63 = vector.load %arg10[%c0_37, %c0_38] : memref<1x64xf32, #tpu.memory_space<vmem>>, vector<1x64xf32>
      %64 = vector.broadcast %63 : vector<1x64xf32> to vector<32x64xf32>
      %65 = arith.addf %62, %64 : vector<32x64xf32>
      %c0_39 = arith.constant 0 : index
      %c0_40 = arith.constant 0 : index
      %66 = vector.load %arg11[%c0_39, %c0_40] : memref<32x64xf32, #tpu.memory_space<vmem>>, vector<32x64xf32>
      tpu.vector_store %arg11[%c0_39, %c0_40], %65 {strides = array<i32>} : memref<32x64xf32, #tpu.memory_space<vmem>>, vector<32x64xf32>,
    } else {
    }
    return
  }
  func.func @transform_0(%arg0: i32, %arg1: i32) -> (i32, i32) {
    %c0_i32 = arith.constant 0 : i32
    %c0_i32_0 = arith.constant 0 : i32
    return %arg0, %c0_i32 : i32, i32
  }
  func.func @transform_1(%arg0: i32, %arg1: i32) -> (i32, i32) {
    %c0_i32 = arith.constant 0 : i32
    %c0_i32_0 = arith.constant 0 : i32
    return %c0_i32, %arg1 : i32, i32
  }
  func.func @transform_2(%arg0: i32, %arg1: i32) -> (i32, i32) {
    %c0_i32 = arith.constant 0 : i32
    %c0_i32_0 = arith.constant 0 : i32
    return %c0_i32, %arg1 : i32, i32
  }
  func.func @transform_3(%arg0: i32, %arg1: i32) -> (i32, i32) {
    %c0_i32 = arith.constant 0 : i32
    %c0_i32_0 = arith.constant 0 : i32
    return %c0_i32, %arg1 : i32, i32
  }
  func.func @transform_4(%arg0: i32, %arg1: i32) -> (i32, i32) {
    %c0_i32 = arith.constant 0 : i32
    %c0_i32_0 = arith.constant 0 : i32
    return %c0_i32, %arg1 : i32, i32
  }
  func.func @transform_5(%arg0: i32, %arg1: i32) -> (i32, i32) {
    %c0_i32 = arith.constant 0 : i32
    %c0_i32_0 = arith.constant 0 : i32
    return %arg1, %c0_i32 : i32, i32
  }
  func.func @transform_6(%arg0: i32, %arg1: i32) -> (i32, i32) {
    %c0_i32 = arith.constant 0 : i32
    %c0_i32_0 = arith.constant 0 : i32
    %c0_i32_1 = arith.constant 0 : i32
    return %c0_i32, %c0_i32_0 : i32, i32
  }
  func.func @transform_7(%arg0: i32, %arg1: i32) -> (i32, i32) {
    %c0_i32 = arith.constant 0 : i32
    %c0_i32_0 = arith.constant 0 : i32
    %c0_i32_1 = arith.constant 0 : i32
    return %c0_i32, %c0_i32_0 : i32, i32
  }
  func.func @transform_8(%arg0: i32, %arg1: i32) -> (i32, i32) {
    %c0_i32 = arith.constant 0 : i32
    %c0_i32_0 = arith.constant 0 : i32
    %c0_i32_1 = arith.constant 0 : i32
    return %c0_i32, %c0_i32_0 : i32, i32
  }
  func.func @transform_9(%arg0: i32, %arg1: i32) -> (i32, i32) {
    %c0_i32 = arith.constant 0 : i32
    %c0_i32_0 = arith.constant 0 : i32
    return %arg0, %c0_i32 : i32, i32
  }
}

</mosaic_0001>

<bundles_post_ra>
// kernel: backbone_forward.5
= control target key start
LH: loop header
LB: loop body
LE: loop exit
PB: predicated region body
PF: predicated region fallthrough
CT: control target
= control target key end

     0   :  { %10 = vsyncpa [#allocation3], 0  ;;  %s409_s15 = smov [#allocation2]   ;;  %s496_s0 = inlined_call_operand.vmem [shape: f32[32,64], index: 0, kind: input, shape index: {}]   ;;  %s497_s1 = inlined_call_operand.hbm [shape: bf16[64,388], index: 1, kind: input, shape index: {}]   ;;  %s498_s2 = inlined_call_operand.vmem [shape: bf16[32,128], index: 2, kind: output, shape index: {0}]   ;;  %s499_s3 = inlined_call_operand.vmem [shape: bf16[32,256], index: 3, kind: output, shape index: {1}]   ;;  %s500_s4 = inlined_call_operand.vmem [shape: f32[32,4], index: 4, kind: output, shape index: {2}]  }
   0x1   :  { %s18_s16 = sshll.u32 %s409_s15, 4  ;;  %s385_s19 = scalar_lea.hbm %s497_s1, 2048  ;;  %s19_s16 = int_to_ptr.vmem [resolvable:$true] %s18_s16 }
   0x2   :  { %p386_p0 = scmp.ne.s32.totalorder %s497_s1, %s385_s19  ;;  %p389_p1 = scmp.lt.u32.totalorder %s385_s19, %s497_s1 }
   0x4   :  { %p391_p2 = pnand %p389_p1, %p386_p0 }
   0x6   :  { %394 = shalt.err (!%p391_p2)
}
   0x7   :  { %s395_s24 = scalar_lea.vmem %s19_s16, 2048  ;;  %p400_p4 = scmp.lt.s32.totalorder %s19_s16, %s19_s16 }
   0x8   :  { %p396_p3 = scmp.ne.s32.totalorder %s19_s16, %s395_s24  ;;  %p401_p5 = scmp.lt.s32.totalorder %s395_s24, %s395_s24 }
   0xa   :  { %p402_p6 = por %p401_p5, %p400_p4 }
   0xc   :  { %p403_p7 = pnand %p402_p6, %p396_p3 }
   0xe   :  { %406 = shalt.err (!%p403_p7)
}
   0xf   :  { %s410_s25 = smov 256   ;;  %s411_s26 = smov 16  }
  0x10   :  { %24 = dma.hbm_to_vmem [thread:$0]  %s497_s1, 2048, %s19_s16, [#allocation3], %s410_s25, %s410_s25, %s411_s26  }
  0x11   :  { %407 = dma.done.wait [#allocation3], 2048  }
  0x12   :  { %408 = vsyncadd [#allocation3], 4294965248  ;;  %v412_v0 = vmov 0   ;;  %v361_v1 = vld [vmem:[#allocation2 + $0x4] ss:$16 sps:$4 sm:$0xff]   ;;  %v30_v18 = vld [vmem:[%s496_s0 + $0x8] sm:$0xff] }
  0x13   :  { %170 = vmatprep.mubr.bf16.mxu0 %v412_v0  ;;  %223 = vmatprep.mubr.bf16.mxu1 %v412_v0  ;;  %v363_v2 = vld [vmem:[#allocation2 + $0xc] ss:$16 sps:$4 sm:$0xff]   ;;  %v365_v3 = vld [vmem:[#allocation2] ss:$16 sps:$4 sm:$0xff]   ;;  %v366_v4 = vld [vmem:[#allocation2 + $0x8] ss:$16 sps:$4 sm:$0xff]  }
  0x14   :  { %138 = vmatprep.subr.bf16.mxu0 %v361_v1  ;;  %191 = vmatprep.subr.bf16.mxu1 %v363_v2  ;;  %v367_v5 = vld [vmem:[#allocation2 + $0x24] ss:$16 sps:$4 sm:$0xff]   ;;  %v369_v6 = vld [vmem:[#allocation2 + $0x2c] ss:$16 sps:$4 sm:$0xff]   ;;  %v371_v7 = vld [vmem:[#allocation2 + $0x20] ss:$16 sps:$4 sm:$0xff]  }
  0x15   :  { %139 = vmatpush1.bf16.msra.mxu0 %v365_v3  ;;  %192 = vmatpush1.bf16.msra.mxu1 %v366_v4  ;;  %v372_v8 = vld [vmem:[#allocation2 + $0x28] ss:$16 sps:$4 sm:$0xff]   ;;  %v373_v9 = vld [vmem:[#allocation2 + $0x44] ss:$16 sps:$4 sm:$0xff]   ;;  %v375_v10 = vld [vmem:[#allocation2 + $0x4c] ss:$16 sps:$4 sm:$0xff]  }
  0x16   :  { %140 = vmatprep.subr.bf16.mxu0 %v367_v5  ;;  %193 = vmatprep.subr.bf16.mxu1 %v369_v6  ;;  %v377_v11 = vld [vmem:[#allocation2 + $0x40] ss:$16 sps:$4 sm:$0xff]   ;;  %v378_v12 = vld [vmem:[#allocation2 + $0x48] ss:$16 sps:$4 sm:$0xff]   ;;  %v379_v13 = vld [vmem:[#allocation2 + $0x64] ss:$16 sps:$4 sm:$0xff]  }
  0x17   :  { %v381_v14 = vld [vmem:[#allocation2 + $0x6c] ss:$16 sps:$4 sm:$0xff]   ;;  %v383_v15 = vld [vmem:[#allocation2 + $0x60] ss:$16 sps:$4 sm:$0xff]   ;;  %v384_v16 = vld [vmem:[#allocation2 + $0x68] ss:$16 sps:$4 sm:$0xff]  }
  0x18   :  { %v29_v17 = vld [vmem:[%s496_s0] sm:$0xff]  ;;  %vm131_vm0 = vcmask 523264   ;;  %v31_v20 = vld [vmem:[%s496_s0 + $0x10] sm:$0xff]  ;;  %v32_v21 = vld [vmem:[%s496_s0 + $0x18] sm:$0xff]  ;;  %vm292_vm1 = vcmask 31744  }
  0x19   :  { %141 = vmatpush1.bf16.msra.mxu0 %v371_v7  ;;  %194 = vmatpush1.bf16.msra.mxu1 %v372_v8  ;;  %v33_v19 = vpack.c.bf16 %v30_v18, %v29_v17  ;;  %v34_v22 = vpack.c.bf16 %v32_v21, %v31_v20 }
  0x1a   :  { %142 = vmatprep.subr.bf16.mxu0 %v373_v9  ;;  %195 = vmatprep.subr.bf16.mxu1 %v375_v10 }
  0x1d   :  { %143 = vmatpush1.bf16.msra.mxu0 %v377_v11  ;;  %196 = vmatpush1.bf16.msra.mxu1 %v378_v12 }
  0x1e   :  { %144 = vmatprep.subr.bf16.mxu0 %v379_v13  ;;  %197 = vmatprep.subr.bf16.mxu1 %v381_v14 }
  0x21   :  { %145 = vmatpush1.bf16.msra.mxu0 %v383_v15  ;;  %198 = vmatpush1.bf16.msra.mxu1 %v384_v16 }
  0x24   :  { %326 = vmatmul.mubr.msk.bf16.vlgmr.msra.gmra.mrb[0].mxu0 %vm131_vm0, %v33_v19  ;;  %328 = vmatmul.mubr.msk.bf16.vlgmr.msra.gmra.mrb[0].mxu1 %vm131_vm0, %v33_v19 }
  0x25   :  { %180 = vmatprep.mubr.bf16.mxu0 %v412_v0  ;;  %233 = vmatprep.mubr.bf16.mxu1 %v412_v0 }
  0x2c   :  { %327 = vmatmul.mubr.msk.bf16.gmra.mrb[4].mxu0 %vm131_vm0, %v34_v22  ;;  %329 = vmatmul.mubr.msk.bf16.gmra.mrb[4].mxu1 %vm131_vm0, %v34_v22 }
  0xf7   :  { %v172_v23 = vpop.f32.mrb[0].mxu0  ;;  %v225_v24 = vpop.f32.mrb[0].mxu1 }
  0xf8   :  { %v174_v25 = vpop.f32.mrb[1].mxu0  ;;  %v227_v26 = vpop.f32.mrb[1].mxu1 }
  0xf9   :  { %v342_v27 = vpack.c.bf16 %v225_v24, %v174_v25  ;;  %293 = vst.msk [vmem:[%s500_s4] sm:$0xff] %vm292_vm1, %v227_v26  ;;  %v176_v28 = vpop.f32.mrb[2].mxu0  ;;  %v229_v29 = vpop.f32.mrb[2].mxu1 }
  0xfa   :  { %v349_v30 = vpack.c.bf16 %v176_v28, %v172_v23  ;;  %v178_v31 = vpop.f32.mrb[3].mxu0  ;;  %v231_v32 = vpop.f32.mrb[3].mxu1 }
  0xfb   :  { %288 = vst [vmem:[%s499_s3] sm:$0xff] %v342_v27  ;;  %v343_v33 = vpack.c.bf16 %v229_v29, %v178_v31  ;;  %294 = vst.msk [vmem:[%s500_s4 + $0x8] sm:$0xff] %vm292_vm1, %v231_v32 }
  0xfc   :  { %350 = vst [vmem:[%s498_s2] sm:$0xff] %v349_v30  }
  0xfd   :  { %289 = vst [vmem:[%s499_s3 + $0x8] sm:$0xff] %v343_v33 }
  0xff   :  { %v182_v34 = vpop.f32.mrb[4].mxu0  ;;  %v235_v35 = vpop.f32.mrb[4].mxu1 }
 0x100   :  { %v184_v36 = vpop.f32.mrb[5].mxu0  ;;  %v237_v37 = vpop.f32.mrb[5].mxu1 }
 0x101   :  { %v344_v38 = vpack.c.bf16 %v235_v35, %v184_v36  ;;  %295 = vst.msk [vmem:[%s500_s4 + $0x10] sm:$0xff] %vm292_vm1, %v237_v37  ;;  %v186_v39 = vpop.f32.mrb[6].mxu0  ;;  %v239_v40 = vpop.f32.mrb[6].mxu1 }
 0x102   :  { %v354_v41 = vpack.c.bf16 %v186_v39, %v182_v34  ;;  %v188_v42 = vpop.f32.mrb[7].mxu0  ;;  %v241_v43 = vpop.f32.mrb[7].mxu1 }
 0x103   :  { %290 = vst [vmem:[%s499_s3 + $0x10] sm:$0xff] %v344_v38  ;;  %v345_v44 = vpack.c.bf16 %v239_v40, %v188_v42  ;;  %296 = vst.msk [vmem:[%s500_s4 + $0x18] sm:$0xff] %vm292_vm1, %v241_v43 }
 0x104   :  { %356 = vst [vmem:[%s498_s2 + $0x8] sm:$0xff] %v354_v41  }
 0x105   :  { %291 = vst [vmem:[%s499_s3 + $0x18] sm:$0xff] %v345_v44 }
 0x106   :  { %309 = vsyncpa [#allocation3], 1 }

// kernel: backbone_forward.6
= control target key start
LH: loop header
LB: loop body
LE: loop exit
PB: predicated region body
PF: predicated region fallthrough
CT: control target
= control target key end

     0   :  { %s622_s15 = smov 0   ;;  %s744_s0 = inlined_call_operand.vmem [shape: bf16[2,16,256], index: 0, kind: input, shape index: {}]   ;;  %s745_s1 = inlined_call_operand.vmem [shape: f32[4,256], index: 1, kind: input, shape index: {}]   ;;  %s746_s2 = inlined_call_operand.vmem [shape: f32[1,256], index: 2, kind: input, shape index: {}]   ;;  %s747_s3 = inlined_call_operand.vmem [shape: bf16[2,16,128], index: 3, kind: output, shape index: {0}]   ;;  %s748_s4 = inlined_call_operand.vmem [shape: bf16[2,16,128], index: 4, kind: output, shape index: {1}]  }
   0x1 LB: > { %s531_s16 = sadd.s32 4294967295, %s595_s15   ;;  %p535_p0 = scmp.ge.s32.totalorder %s595_s15, 1  ;;  %s595_s15 = sphi %s622_s15, %s15_s15  }
   0x2   : > { %p165_p1 = scmp.lt.s32.totalorder %s595_s15, 3 }
   0x4   : > { %p166_p2 = pnand %p535_p0, %p165_p1 }
   0x5   : > { %p196_p3 = scmp.lt.s32.totalorder (!%p166_p2), %s531_s16, 1  ;;  %v218_v0 = vlaneseq (!%p166_p2)  ;;  %v637_v2 = vld [vmem:[%s745_s1] sm:$0xff] (!%p166_p2) }
   0x6   : > { %169 = sbr.rel (%p166_p2) target bundleno = 74 (0x4a), region = 32 }
   0x7   : > { %v632_v1 = vshrl.u32 (!%p166_p2), %v218_v0, 7 }
   0x9   : > { %v224_v3 = vsub.s32 (!%p166_p2), 3, %v632_v1  ;;  %v228_v4 = vsub.s32 (!%p166_p2), 7, %v632_v1  ;;  %vm244_vm0 = vcmp.ge.s32.totalorder (!%p166_p2), %v632_v1, 3  ;;  %vm250_vm1 = vcmp.lt.s32.totalorder (!%p166_p2), %v632_v1, 3 }
   0xa   : > { %v648_v5 = vsub.s32 (!%p166_p2), 0, %v632_v1  ;;  %v269_v6 = vsub.s32 (!%p166_p2), 4, %v632_v1  ;;  %vm295_vm2 = vcmp.lt.s32.totalorder (!%p166_p2), %v632_v1, 2  ;;  %vm289_vm3 = vcmp.ge.s32.totalorder (!%p166_p2), %v632_v1, 2 }
   0xb   : > { %v225_v9 = vrot.slane (!%p166_p2), %v637_v2, %v224_v3  ;;  %v229_v10 = vrot.slane (!%p166_p2), %v637_v2, %v228_v4  ;;  %v656_v11 = vsub.s32 (!%p166_p2), 1, %v632_v1  ;;  %v314_v12 = vsub.s32 (!%p166_p2), 5, %v632_v1 }
   0xc   : > { %v266_v19 = vrot.slane (!%p166_p2), %v637_v2, %v648_v5  ;;  %v270_v20 = vrot.slane (!%p166_p2), %v637_v2, %v269_v6  ;;  %vm340_vm4 = vcmp.lt.s32.totalorder (!%p166_p2), %v632_v1, 1  ;;  %vm334_vm5 = vcmp.ge.s32.totalorder (!%p166_p2), %v632_v1, 1 }
   0xd   : > { %s750_s16 = smov (!%p196_p3, %s531_s16), 1  ;;  %v235_v17 = vrot.slane %v225_v9, %v224_v3  ;;  %v239_v18 = vrot.slane %v229_v10, %v224_v3  ;;  %v311_v54 = vrot.slane %v637_v2, %v656_v11  ;;  %v315_v55 = vrot.slane %v637_v2, %v314_v12 }
   0xe   : > { %s548_s19 = sshll.u32 %s750_s16, 4  ;;  %v276_v35 = vrot.slane %v266_v19, %v648_v5  ;;  %v280_v36 = vrot.slane %v270_v20, %v648_v5  ;;  %v355_v0 = vsub.s32 2, %v632_v1  ;;  %v359_v3 = vsub.s32 6, %v632_v1  ;;  %s549_s25 = sshll.u32 %s750_s16, 3 }
   0xf   : > { %s200_s22 = scalar_lea.vmem %s744_s0, %s548_s19  ;;  %v321_v60 = vrot.slane %v311_v54, %v656_v11  ;;  %v325_v61 = vrot.slane %v315_v55, %v656_v11  ;;  %s205_s28 = scalar_lea.vmem %s747_s3, %s549_s25 }
  0x10   : > { %v211_v7 = vld [vmem:[%s200_s22] sm:$0xff]  ;;  %v212_v8 = vld [vmem:[%s200_s22 + $0x8] sm:$0xff]  ;;  %v356_v10 = vrot.slane %v637_v2, %v355_v0  ;;  %s210_s5 = scalar_lea.vmem %s748_s4, %s549_s25 }
  0x11   : > { %v659_v13 = vunpack.c.l.bf16 %v211_v7  ;;  %v661_v14 = vunpack.c.h.bf16 %v211_v7  ;;  %v215_v15 = vunpack.c.l.bf16 %v212_v8  ;;  %v663_v16 = vunpack.c.h.bf16 %v212_v8 }
  0x13   : > { %v246_v21 = vrot.slane %v659_v13, 5  ;;  %v247_v22 = vrot.slane %v661_v14, 5  ;;  %v248_v23 = vrot.slane %v215_v15, 5  ;;  %v249_v24 = vrot.slane %v663_v16, 5 }
  0x14   : > { %v240_v25 = vmul.f32 %v235_v17, %v659_v13  ;;  %v241_v26 = vmul.f32 %v239_v18, %v661_v14  ;;  %v242_v27 = vmul.f32 %v235_v17, %v215_v15  ;;  %v243_v28 = vmul.f32 %v239_v18, %v663_v16 }
  0x15   : > { %v251_v29 = vsel %vm250_vm1, %v246_v21, %v248_v23  ;;  %v252_v30 = vsel %vm250_vm1, %v247_v22, %v249_v24  ;;  %v253_v31 = vsel %vm250_vm1, %v248_v23, %v246_v21  ;;  %v254_v32 = vsel %vm250_vm1, %v249_v24, %v247_v22 }
  0x16   : > { %v259_v33 = vsel %vm244_vm0, %v253_v31, 0.0  ;;  %v260_v34 = vsel %vm244_vm0, %v254_v32, 0.0  ;;  %v291_v37 = vrot.slane %v659_v13, 6  ;;  %v292_v38 = vrot.slane %v661_v14, 6 }
  0x17   : > { %v293_v39 = vrot.slane %v215_v15, 6  ;;  %v294_v40 = vrot.slane %v663_v16, 6  ;;  %v281_v41 = vmul.f32 %v276_v35, %v259_v33  ;;  %v282_v42 = vmul.f32 %v280_v36, %v260_v34 }
  0x18   : > { %v283_v43 = vmul.f32 %v276_v35, %v251_v29  ;;  %v284_v44 = vmul.f32 %v280_v36, %v252_v30  ;;  %v336_v57 = vrot.slane %v659_v13, 7  ;;  %v337_v58 = vrot.slane %v661_v14, 7  ;;  %v379_v14 = vld [vmem:[%s746_s2] sm:$0x3] }
  0x19   : > { %v296_v45 = vsel %vm295_vm2, %v291_v37, %v293_v39  ;;  %v298_v46 = vsel %vm295_vm2, %v293_v39, %v291_v37  ;;  %v299_v47 = vsel %vm295_vm2, %v294_v40, %v292_v38  ;;  %v285_v48 = vadd.f32 %v281_v41, %v240_v25 }
  0x1a   : > { %v286_v49 = vadd.f32 %v282_v42, %v241_v26  ;;  %v287_v50 = vadd.f32 %v283_v43, %v242_v27  ;;  %v297_v51 = vsel %vm295_vm2, %v292_v38, %v294_v40  ;;  %v288_v52 = vadd.f32 %v284_v44, %v243_v28 }
  0x1b   : > { %v304_v53 = vsel %vm289_vm3, %v298_v46, 0.0  ;;  %v305_v56 = vsel %vm289_vm3, %v299_v47, 0.0  ;;  %v338_v59 = vrot.slane %v215_v15, 7  ;;  %v339_v62 = vrot.slane %v663_v16, 7 }
  0x1c   : > { %v326_v4 = vmul.f32 %v321_v60, %v304_v53  ;;  %v327_v6 = vmul.f32 %v325_v61, %v305_v56  ;;  %v328_v7 = vmul.f32 %v321_v60, %v296_v45  ;;  %v329_v8 = vmul.f32 %v325_v61, %v297_v51 }
  0x1d   : > { %v343_v63 = vsel %vm340_vm4, %v338_v59, %v336_v57  ;;  %v344_v9 = vsel %vm340_vm4, %v339_v62, %v337_v58  ;;  %v341_v12 = vsel %vm340_vm4, %v336_v57, %v338_v59  ;;  %v360_v17 = vrot.slane %v637_v2, %v359_v3 }
  0x1e   : > { %v349_v13 = vsel %vm334_vm5, %v343_v63, 0.0  ;;  %v330_v15 = vadd.f32 %v326_v4, %v285_v48  ;;  %v332_v16 = vadd.f32 %v328_v7, %v287_v50  ;;  %v366_v18 = vrot.slane %v356_v10, %v355_v0 }
  0x1f   : > { %v331_v19 = vadd.f32 %v327_v6, %v286_v49  ;;  %v333_v20 = vadd.f32 %v329_v8, %v288_v52  ;;  %v342_v21 = vsel %vm340_vm4, %v337_v58, %v339_v62  ;;  %v350_v22 = vsel %vm334_vm5, %v344_v9, 0.0 }
  0x20   : > { %v370_v23 = vrot.slane %v360_v17, %v355_v0  ;;  %v371_v24 = vmul.f32 %v366_v18, %v349_v13  ;;  %v373_v25 = vmul.f32 %v366_v18, %v341_v12  ;;  %v384_v26 = vrot.slane %v379_v14, %v648_v5 }
  0x21   : > { %v388_v27 = vrot.slane %v379_v14, %v656_v11 }
  0x22   : > { %v372_v28 = vmul.f32 %v370_v23, %v350_v22  ;;  %v374_v29 = vmul.f32 %v370_v23, %v342_v21  ;;  %v375_v30 = vadd.f32 %v371_v24, %v330_v15  ;;  %v377_v2 = vadd.f32 %v373_v25, %v332_v16 }
  0x24   : > { %v376_v31 = vadd.f32 %v372_v28, %v331_v19  ;;  %v378_v32 = vadd.f32 %v374_v29, %v333_v20  ;;  %v391_v33 = vadd.f32 %v384_v26, %v375_v30  ;;  %v393_v34 = vadd.f32 %v384_v26, %v377_v2 }
  0x26   : > { %v392_v35 = vadd.f32 %v388_v27, %v376_v31  ;;  %v394_v36 = vadd.f32 %v388_v27, %v378_v32  ;;  %v395_v37 = vsub.f32 0.0, %v391_v33  ;;  %v397_v1 = vsub.f32 0.0, %v393_v34 }
  0x28   : > { %v396_v38 = vsub.f32 0.0, %v392_v35  ;;  %v398_v39 = vsub.f32 0.0, %v394_v36  ;;  %v399_v40 = vmul.f32 1.442695, %v395_v37  ;;  %v403_v41 = vmul.f32 1.442695, %v397_v1 }
  0x2a   : > { %573 = vpow2.f32 %v399_v40  ;;  %v401_v5 = vmul.f32 1.442695, %v396_v38  ;;  %v405_v42 = vmul.f32 1.442695, %v398_v39 }
  0x2b   : > { %575 = vpow2.f32 %v403_v41 }
  0x2c   : > { %577 = vpow2.f32 %v401_v5 }
  0x2d   : > { %579 = vpow2.f32 %v405_v42 }
  0x34   : > { %v574_v11 = vpop.eup %573 }
  0x35   : > { %v576_v43 = vpop.eup %575  ;;  %v407_v44 = vadd.f32 1.0, %v574_v11 }
  0x36   : > { %v578_v45 = vpop.eup %577  ;;  %v409_v46 = vadd.f32 1.0, %v576_v43 }
  0x37   : > { %v580_v47 = vpop.eup %579  ;;  %v408_v48 = vadd.f32 1.0, %v578_v45  ;;  %581 = vrcp.f32 %v407_v44 }
  0x38   : > { %v410_v49 = vadd.f32 1.0, %v580_v47  ;;  %583 = vrcp.f32 %v409_v46 }
  0x39   : > { %585 = vrcp.f32 %v408_v48 }
  0x3a   : > { %587 = vrcp.f32 %v410_v49 }
  0x41   : > { %v582_v50 = vpop.eup %581 }
  0x42   : > { %v584_v51 = vpop.eup %583  ;;  %v419_v52 = vmul.f32 %v582_v50, %v391_v33 }
  0x43   : > { %v586_v53 = vpop.eup %585  ;;  %v421_v54 = vmul.f32 %v584_v51, %v393_v34 }
  0x44   : > { %v588_v55 = vpop.eup %587  ;;  %v420_v56 = vmul.f32 %v586_v53, %v392_v35 }
  0x45   : > { %v422_v57 = vmul.f32 %v588_v55, %v394_v36  ;;  %v558_v58 = vpack.c.bf16 %v421_v54, %v419_v52 }
  0x47   : > { %559 = vst [vmem:[%s205_s28] sm:$0xff] %v558_v58   ;;  %v563_v59 = vpack.c.bf16 %v422_v57, %v420_v56 }
  0x49   : > { %564 = vst [vmem:[%s210_s5] sm:$0xff] %v563_v59  }
  0x4a PF: > { %s15_s15 = sadd.s32 1, %s595_s15  }
  0x4b   : > { %p12_p4 = scmp.ge.s32.totalorder %s15_s15, 4  }
  0x4d   :  { %14 = sbr.rel (!%p12_p4) target bundleno = 1 (0x1), region = 74 }

// kernel: backbone_forward.8
= control target key start
LH: loop header
LB: loop body
LE: loop exit
PB: predicated region body
PF: predicated region fallthrough
CT: control target
= control target key end

     0   :  { %vm234_vm0 = vcmask 523264   ;;  %vm326_vm1 = vcmask 519168   ;;  %s559_s1 = inlined_call_operand.vmem [shape: bf16[32,128], index: 1, kind: input, shape index: {}]   ;;  %s560_s4 = inlined_call_operand.vmem [shape: bf16[128,64], index: 4, kind: input, shape index: {}]   ;;  %s561_s0 = inlined_call_operand.vmem [shape: bf16[32,128], index: 0, kind: input, shape index: {}]   ;;  %s562_s3 = inlined_call_operand.vmem [shape: f32[1,128], index: 3, kind: input, shape index: {}]   ;;  %s563_s2 = inlined_call_operand.vmem [shape: f32[32,64], index: 2, kind: input, shape index: {}]   ;;  %s564_s5 = inlined_call_operand.vmem [shape: f32[1,64], index: 5, kind: input, shape index: {}]   ;;  %s565_s6 = inlined_call_operand.vmem [shape: f32[1,64], index: 6, kind: input, shape index: {}]   ;;  %s566_s7 = inlined_call_operand.vmem [shape: bf16[32,64], index: 7, kind: output, shape index: {}]  }
   0x1   :  { %v371_v0 = vld [vmem:[%s559_s1 + $0x8] sm:$0xff]   ;;  %v363_v2 = vld [vmem:[%s559_s1] sm:$0xff]   ;;  %v404_v46 = vld [vmem:[%s560_s4 + $0x10] sm:$0xff]  }
   0x2   :  { %v368_v1 = vunpack.c.l.bf16 %v371_v0  ;;  %v364_v3 = vunpack.c.l.bf16 %v363_v2  ;;  %v369_v4 = vunpack.c.h.bf16 %v371_v0  ;;  %v365_v5 = vunpack.c.h.bf16 %v363_v2  ;;  %v402_v6 = vld [vmem:[%s560_s4] sm:$0xff]   ;;  %v403_v8 = vld [vmem:[%s560_s4 + $0x8] sm:$0xff]   ;;  %v405_v47 = vld [vmem:[%s560_s4 + $0x18] sm:$0xff]  }
   0x3   :  { %382 = vmatprep.subr.bf16.mxu0 %v402_v6  ;;  %v370_v24 = vld [vmem:[%s561_s0 + $0x8] sm:$0xff]   ;;  %v355_v25 = vld [vmem:[%s561_s0] sm:$0xff]   ;;  %v408_v50 = vld [vmem:[%s560_s4 + $0x30] sm:$0xff]  }
   0x4   :  { %v45_v7 = vsub.f32 0.0, %v368_v1  ;;  %v43_v9 = vsub.f32 0.0, %v364_v3  ;;  %v46_v10 = vsub.f32 0.0, %v369_v4  ;;  %v44_v11 = vsub.f32 0.0, %v365_v5  ;;  %383 = vmatpush3.bf16.msra.mxu0 %v402_v6  ;;  %v406_v48 = vld [vmem:[%s560_s4 + $0x20] sm:$0xff]   ;;  %v407_v49 = vld [vmem:[%s560_s4 + $0x28] sm:$0xff]  }
   0x5   :  { %384 = vmatprep.subr.bf16.mxu0 %v403_v8  ;;  %v360_v26 = vunpack.c.l.bf16 %v370_v24  ;;  %v356_v28 = vunpack.c.l.bf16 %v355_v25  ;;  %v361_v31 = vunpack.c.h.bf16 %v370_v24  ;;  %v357_v34 = vunpack.c.h.bf16 %v355_v25  ;;  %v409_v51 = vld [vmem:[%s560_s4 + $0x38] sm:$0xff]  }
   0x6   :  { %v51_v12 = vmul.f32 1.442695, %v45_v7  ;;  %v47_v13 = vmul.f32 1.442695, %v43_v9  ;;  %v53_v14 = vmul.f32 1.442695, %v46_v10 }
   0x7   :  { %v49_v15 = vmul.f32 1.442695, %v44_v11 }
   0x8   :  { %410 = vpow2.f32 %v51_v12  ;;  %385 = vmatpush3.bf16.msra.mxu0 %v403_v8 }
   0x9   :  { %412 = vpow2.f32 %v47_v13  ;;  %386 = vmatprep.subr.bf16.mxu0 %v404_v46 }
   0xa   :  { %414 = vpow2.f32 %v53_v14 }
   0xb   :  { %416 = vpow2.f32 %v49_v15  ;;  %v133_v15 = vld [vmem:[%s563_s2] sm:$0xff] }
   0xc   :  { %387 = vmatpush3.bf16.msra.mxu0 %v404_v46 }
   0xd   :  { %388 = vmatprep.subr.bf16.mxu0 %v405_v47 }
  0x10   :  { %389 = vmatpush3.bf16.msra.mxu0 %v405_v47 }
  0x11   :  { %390 = vmatprep.subr.bf16.mxu0 %v406_v48 }
  0x12   :  { %v411_v16 = vpop.eup %410 }
  0x13   :  { %v413_v17 = vpop.eup %412  ;;  %v57_v18 = vadd.f32 1.0, %v411_v16 }
  0x14   :  { %v415_v19 = vpop.eup %414  ;;  %v55_v20 = vadd.f32 1.0, %v413_v17  ;;  %391 = vmatpush3.bf16.msra.mxu0 %v406_v48  ;;  %v135_v17 = vld [vmem:[%s563_s2 + $0x10] sm:$0xff] }
  0x15   :  { %v417_v21 = vpop.eup %416  ;;  %418 = vrcp.f32 %v57_v18  ;;  %v58_v22 = vadd.f32 1.0, %v415_v19  ;;  %392 = vmatprep.subr.bf16.mxu0 %v407_v49  ;;  %v134_v19 = vld [vmem:[%s563_s2 + $0x8] sm:$0xff] }
  0x16   :  { %420 = vrcp.f32 %v55_v20  ;;  %v56_v23 = vadd.f32 1.0, %v417_v21 }
  0x17   :  { %422 = vrcp.f32 %v58_v22  ;;  %v136_v22 = vld [vmem:[%s563_s2 + $0x18] sm:$0xff] }
  0x18   :  { %424 = vrcp.f32 %v56_v23  ;;  %393 = vmatpush3.bf16.msra.mxu0 %v407_v49 }
  0x19   :  { %394 = vmatprep.subr.bf16.mxu0 %v408_v50 }
  0x1c   :  { %395 = vmatpush3.bf16.msra.mxu0 %v408_v50 }
  0x1d   :  { %396 = vmatprep.subr.bf16.mxu0 %v409_v51 }
  0x1f   :  { %v419_v27 = vpop.eup %418 }
  0x20   :  { %v421_v29 = vpop.eup %420  ;;  %v69_v30 = vmul.f32 %v419_v27, %v368_v1  ;;  %397 = vmatpush3.bf16.msra.mxu0 %v409_v51 }
  0x21   :  { %v423_v32 = vpop.eup %422  ;;  %v67_v33 = vmul.f32 %v421_v29, %v364_v3 }
  0x22   :  { %v425_v35 = vpop.eup %424  ;;  %v73_v36 = vmul.f32 %v360_v26, %v69_v30  ;;  %v70_v37 = vmul.f32 %v423_v32, %v369_v4 }
  0x23   :  { %v71_v38 = vmul.f32 %v356_v28, %v67_v33  ;;  %v68_v39 = vmul.f32 %v425_v35, %v365_v5  ;;  %v335_v5 = vld [vmem:[%s562_s3] ss:$0 sm:$0xff] }
  0x24   :  { %v77_v40 = vmul.f32 %v73_v36, %v73_v36  ;;  %v74_v41 = vmul.f32 %v361_v31, %v70_v37 }
  0x25   :  { %v75_v42 = vmul.f32 %v71_v38, %v71_v38  ;;  %v72_v43 = vmul.f32 %v357_v34, %v68_v39 }
  0x26   :  { %83 = vadd.xlane.f32.xlu1 %v77_v40  ;;  %v78_v44 = vmul.f32 %v74_v41, %v74_v41 }
  0x27   :  { %79 = vadd.xlane.f32.xlu0 %v75_v42  ;;  %v76_v45 = vmul.f32 %v72_v43, %v72_v43 }
  0x2a   :  { %85 = vadd.xlane.f32.xlu1 %v78_v44 }
  0x2b   :  { %81 = vadd.xlane.f32.xlu0 %v76_v45 }
  0xb3   :  { %v84_v52 = vpop.xlane.xlu1 %83 }
  0xb4   :  { %v90_v53 = vmul.f32 0.0078125, %v84_v52  ;;  %v80_v54 = vpop.xlane.xlu0 %79 }
  0xb5   :  { %v88_v55 = vmul.f32 0.0078125, %v80_v54 }
  0xb6   :  { %v94_v56 = vadd.f32 1e-05, %v90_v53 }
  0xb7   :  { %v92_v57 = vadd.f32 1e-05, %v88_v55  ;;  %v86_v58 = vpop.xlane.xlu1 %85 }
  0xb8   :  { %426 = vrsqrt.f32 %v94_v56  ;;  %v91_v59 = vmul.f32 0.0078125, %v86_v58  ;;  %v82_v60 = vpop.xlane.xlu0 %81 }
  0xb9   :  { %428 = vrsqrt.f32 %v92_v57  ;;  %v89_v61 = vmul.f32 0.0078125, %v82_v60 }
  0xba   :  { %v95_v62 = vadd.f32 1e-05, %v91_v59 }
  0xbb   :  { %v93_v63 = vadd.f32 1e-05, %v89_v61 }
  0xbc   :  { %430 = vrsqrt.f32 %v95_v62 }
  0xbd   :  { %432 = vrsqrt.f32 %v93_v63 }
  0xc2   :  { %v427_v0 = vpop.eup %426 }
  0xc3   :  { %v429_v1 = vpop.eup %428  ;;  %v102_v2 = vmul.f32 %v427_v0, %v73_v36  ;;  %v344_v0 = vld [vmem:[%s564_s5] ss:$0 sm:$0xff] }
  0xc4   :  { %v100_v4 = vmul.f32 %v429_v1, %v71_v38 }
  0xc5   :  { %v113_v9 = vmul.f32 %v335_v5, %v102_v2 }
  0xc6   :  { %v431_v3 = vpop.eup %430  ;;  %v111_v11 = vmul.f32 %v335_v5, %v100_v4 }
  0xc7   :  { %v433_v6 = vpop.eup %432  ;;  %v103_v7 = vmul.f32 %v431_v3, %v74_v41  ;;  %v345_v3 = vld [vmem:[%s565_s6] ss:$0 sm:$0xff] }
  0xc8   :  { %v101_v8 = vmul.f32 %v433_v6, %v72_v43 }
  0xc9   :  { %v114_v10 = vmul.f32 %v335_v5, %v103_v7 }
  0xca   :  { %v112_v12 = vmul.f32 %v335_v5, %v101_v8 }
  0xcb   :  { %v116_v13 = vpack.c.bf16 %v114_v10, %v113_v9 }
  0xcc   :  { %v115_v14 = vpack.c.bf16 %v112_v12, %v111_v11 }
  0xce   :  { %398 = vmatprep.mubr.bf16.mxu0 %v115_v14 }
  0xcf   :  { %399 = vmatmul.mubr.bf16.vlgmr.msra.gmra.mrb[0].mxu0 %v116_v13 }
 0x1a2   :  { %v400_v16 = vpop.f32.mrb[0].mxu0 }
 0x1a3   :  { %v219_v18 = vpop.f32.mrb[1].mxu0  ;;  %v228_v24 = vadd.f32 %v400_v16, %v135_v17 }
 0x1a4   :  { %v220_v20 = vadd.f32 %v219_v18, %v133_v15  ;;  %v401_v21 = vpop.f32.mrb[2].mxu0 }
 0x1a5   :  { %v222_v23 = vpop.f32.mrb[3].mxu0  ;;  %v231_v27 = vadd.f32 %v401_v21, %v136_v22  ;;  %v241_v29 = vsel %vm234_vm0, %v228_v24, 0.0 }
 0x1a6   :  { %v223_v25 = vadd.f32 %v222_v23, %v134_v19  ;;  %v235_v26 = vsel %vm234_vm0, %v220_v20, 0.0 }
 0x1a7   :  { %236 = vadd.xlane.f32.xlu0 %v235_v26  ;;  %v244_v30 = vsel %vm234_vm0, %v231_v27, 0.0 }
 0x1a8   :  { %v238_v28 = vsel %vm234_vm0, %v223_v25, 0.0 }
 0x1a9   :  { %239 = vadd.xlane.f32.xlu1 %v238_v28 }
 0x1ab   :  { %242 = vadd.xlane.f32.xlu0 %v241_v29 }
 0x1ad   :  { %245 = vadd.xlane.f32.xlu1 %v244_v30 }
 0x234   :  { %v237_v31 = vpop.xlane.xlu0 %236 }
 0x235   :  { %v248_v32 = vmul.f32 0.015625, %v237_v31 }
 0x236   :  { %v240_v33 = vpop.xlane.xlu1 %239 }
 0x237   :  { %v252_v34 = vsub.f32 %v220_v20, %v248_v32  ;;  %v249_v35 = vmul.f32 0.015625, %v240_v33 }
 0x238   :  { %v243_v36 = vpop.xlane.xlu0 %242 }
 0x239   :  { %v253_v37 = vsub.f32 %v223_v25, %v249_v35  ;;  %v250_v38 = vmul.f32 0.015625, %v243_v36  ;;  %v256_v39 = vmul.f32 %v252_v34, %v252_v34 }
 0x23a   :  { %v246_v40 = vpop.xlane.xlu1 %245 }
 0x23b   :  { %v254_v41 = vsub.f32 %v228_v24, %v250_v38  ;;  %v251_v42 = vmul.f32 0.015625, %v246_v40  ;;  %v260_v43 = vsel %vm234_vm0, %v256_v39, 0.0  ;;  %v257_v44 = vmul.f32 %v253_v37, %v253_v37 }
 0x23c   :  { %261 = vadd.xlane.f32.xlu0 %v260_v43 }
 0x23d   :  { %v255_v45 = vsub.f32 %v231_v27, %v251_v42  ;;  %v263_v46 = vsel %vm234_vm0, %v257_v44, 0.0  ;;  %v258_v47 = vmul.f32 %v254_v41, %v254_v41 }
 0x23e   :  { %264 = vadd.xlane.f32.xlu1 %v263_v46 }
 0x23f   :  { %v266_v48 = vsel %vm234_vm0, %v258_v47, 0.0  ;;  %v259_v49 = vmul.f32 %v255_v45, %v255_v45 }
 0x240   :  { %267 = vadd.xlane.f32.xlu0 %v266_v48 }
 0x241   :  { %v269_v50 = vsel %vm234_vm0, %v259_v49, 0.0 }
 0x242   :  { %270 = vadd.xlane.f32.xlu1 %v269_v50 }
 0x2c9   :  { %v262_v51 = vpop.xlane.xlu0 %261 }
 0x2ca   :  { %v272_v52 = vmul.f32 0.015625, %v262_v51 }
 0x2cb   :  { %v265_v53 = vpop.xlane.xlu1 %264 }
 0x2cc   :  { %v276_v54 = vadd.f32 1e-05, %v272_v52  ;;  %v273_v55 = vmul.f32 0.015625, %v265_v53 }
 0x2cd   :  { %v268_v56 = vpop.xlane.xlu0 %267 }
 0x2ce   :  { %434 = vrsqrt.f32 %v276_v54  ;;  %v277_v57 = vadd.f32 1e-05, %v273_v55  ;;  %v274_v58 = vmul.f32 0.015625, %v268_v56 }
 0x2cf   :  { %v271_v59 = vpop.xlane.xlu1 %270 }
 0x2d0   :  { %436 = vrsqrt.f32 %v277_v57  ;;  %v278_v60 = vadd.f32 1e-05, %v274_v58  ;;  %v275_v61 = vmul.f32 0.015625, %v271_v59 }
 0x2d2   :  { %438 = vrsqrt.f32 %v278_v60  ;;  %v279_v62 = vadd.f32 1e-05, %v275_v61 }
 0x2d4   :  { %440 = vrsqrt.f32 %v279_v62 }
 0x2d8   :  { %v435_v63 = vpop.eup %434 }
 0x2d9   :  { %v284_v1 = vmul.f32 %v435_v63, %v252_v34 }
 0x2da   :  { %v437_v2 = vpop.eup %436 }
 0x2db   :  { %v295_v4 = vmul.f32 %v344_v0, %v284_v1  ;;  %v285_v5 = vmul.f32 %v437_v2, %v253_v37 }
 0x2dc   :  { %v439_v6 = vpop.eup %438 }
 0x2dd   :  { %v306_v7 = vadd.f32 %v345_v3, %v295_v4  ;;  %v296_v8 = vmul.f32 %v344_v0, %v285_v5  ;;  %v286_v9 = vmul.f32 %v439_v6, %v254_v41 }
 0x2de   :  { %v441_v10 = vpop.eup %440 }
 0x2df   :  { %v350_v11 = vpack.c.bf16 %v306_v7, %v306_v7  ;;  %v307_v12 = vadd.f32 %v345_v3, %v296_v8  ;;  %v297_v13 = vmul.f32 %v344_v0, %v286_v9  ;;  %v287_v14 = vmul.f32 %v441_v10, %v255_v45 }
 0x2e1   :  { %327 = vst.msk [vmem:[%s566_s7] sm:$0xf] %vm326_vm1, %v350_v11  ;;  %v351_v15 = vpack.c.bf16 %v307_v12, %v307_v12  ;;  %v308_v16 = vadd.f32 %v345_v3, %v297_v13  ;;  %v298_v17 = vmul.f32 %v344_v0, %v287_v14 }
 0x2e3   :  { %328 = vst.msk [vmem:[%s566_s7 + $0x4] sm:$0xf] %vm326_vm1, %v351_v15  ;;  %v352_v18 = vpack.c.bf16 %v308_v16, %v308_v16  ;;  %v309_v19 = vadd.f32 %v345_v3, %v298_v17 }
 0x2e5   :  { %329 = vst.msk [vmem:[%s566_s7 + $0x8] sm:$0xf] %vm326_vm1, %v352_v18  ;;  %v353_v20 = vpack.c.bf16 %v309_v19, %v309_v19 }
 0x2e7   :  { %330 = vst.msk [vmem:[%s566_s7 + $0xc] sm:$0xf] %vm326_vm1, %v353_v20 }

// kernel: backbone_forward.7
= control target key start
LH: loop header
LB: loop body
LE: loop exit
PB: predicated region body
PF: predicated region fallthrough
CT: control target
= control target key end

     0   :  { %s1270_s21 = smov 0   ;;  %s1272_s22 = smov 0   ;;  %s1376_s0 = inlined_call_operand.vmem [shape: bf16[2,16,128], index: 0, kind: input, shape index: {}]   ;;  %s1377_s1 = inlined_call_operand.vmem [shape: f32[2,16,4], index: 1, kind: input, shape index: {}]   ;;  %s1378_s2 = inlined_call_operand.vmem [shape: bf16[2,16,128], index: 2, kind: input, shape index: {}]   ;;  %s1379_s3 = inlined_call_operand.vmem [shape: f32[1,4], index: 3, kind: input, shape index: {}]   ;;  %s1380_s4 = inlined_call_operand.vmem [shape: f32[1,4], index: 4, kind: input, shape index: {}]   ;;  %s1381_s5 = inlined_call_operand.vmem [shape: f32[1,128], index: 5, kind: input, shape index: {}]   ;;  %s1382_s6 = inlined_call_operand.vmem [shape: bf16[2,16,128], index: 6, kind: output, shape index: {}]  }
   0x1   :  { %s1274_s23 = smov 0  }
   0x2 LB: > { %s28_s24 = sadd.s32 1, %s1221_s22  ;;  %p1052_p0 = scmp.ge.s32.totalorder %s1225_s23, 1  ;;  %s1225_s23 = sphi %s1274_s23, %s16_s23   ;;  %s1221_s22 = sphi %s1272_s22, %s1384_s22   ;;  %s1217_s21 = sphi %s1270_s21, %s1383_s21  }
   0x3   : > { %p30_p1 = scmp.ge.s32.totalorder %s28_s24, 2  ;;  %p267_p2 = scmp.lt.s32.totalorder %s1225_s23, 3 }
   0x5   : > { %s1386_s24 = smov (%p30_p1, %s28_s24), 0  ;;  %p268_p3 = pnand %p1052_p0, %p267_p2 }
   0x6   : > { %p324_p4 = scmp.lt.s32.totalorder (!%p268_p3), %s1217_s21, 1  ;;  %v416_v0 = vlaneseq (!%p268_p3)  ;;  %v1227_v1 = vmov (!%p268_p3), 0.0   ;;  %vm1228_vm0 = vmmov (!%p268_p3), 0   ;;  %vm434_vm1 = vcmask (!%p268_p3), 130048   ;;  %v1061_v5 = vld [vmem:[%s1380_s4] ss:$0 sm:$0xff] (!%p268_p3) }
   0x7   : > { %271 = sbr.rel (%p268_p3) target bundleno = 669 (0x29d), region = 44  ;;  %1117 = vmatprep.subr.bf16.mxu0 (!%p268_p3), %v1227_v1  ;;  %1119 = vmatprep.mubr.msk.bf16.mxu0 (!%p268_p3), %vm1228_vm0, %v1227_v1  ;;  %v1229_v4 = vmov (!%p268_p3), 0.0|0.0   ;;  %s1230_s11 = smov (!%p268_p3), 64   ;;  %v382_v18 = vld [vmem:[%s1379_s3] sm:$0x1] (!%p268_p3)  ;;  %vm557_vm4 = vcmask (!%p268_p3), 523264  }
   0x8   : > { %v1289_v2 = vshrl.u32 (!%p268_p3), %v416_v0, 7  ;;  %v1291_v3 = vand.u32 (!%p268_p3), 127, %v416_v0  ;;  %1118 = vmatpush3.bf16.msra.mxu0 (!%p268_p3), %v1229_v4  ;;  %v383_v19 = vmul.f32 (!%p268_p3), 1.442695, %v382_v18  ;;  %v1231_v43 = vmov (!%p268_p3), 0  }
   0x9   : > { %1123 = vmatprep.subr.bf16.mxu0 (!%p268_p3), %v1227_v1  ;;  %1169 = vset.pattern.permute.xlu1 (!%p268_p3), %v1231_v43  ;;  %v1232_v55 = vmov (!%p268_p3), 1   ;;  %v1233_v56 = vmov (!%p268_p3), 2   ;;  %v1234_v58 = vmov (!%p268_p3), 3   ;;  %vm554_vm5 = vcmask (!%p268_p3), 261120  }
   0xa   : > { %vm428_vm2 = vcmp.le.s32.totalorder (!%p268_p3), %v1291_v3, %v1289_v2  ;;  %v418_v26 = vsub.s32 (!%p268_p3), 0, %v1289_v2  ;;  %v1320_v36 = vadd.s32 (!%p268_p3), 8, %v1289_v2  ;;  %1172 = vset.pattern.permute.xlu0 (!%p268_p3), %v1231_v43  ;;  %vm560_vm6 = vcmask (!%p268_p3), 785408  }
   0xb   : > { %v1062_v6 = vsel (!%p268_p3), %vm428_vm2, 1.0, %v1227_v1 }
   0xc   : > { %1108 = vmatprep.mubr.msk.f32.mxu1 (!%p268_p3), %vm434_vm1, %v1062_v6  ;;  %vm429_vm3 = vcmp.le.s32.totalorder (!%p268_p3), %v1291_v3, %v1320_v36 }
   0xd   : > { %v1063_v40 = vsel (!%p268_p3), %vm429_vm3, 1.0, %v1227_v1 }
   0xe   : > { %s1388_s21 = smov (!%p324_p4, %s1217_s21), 1 }
   0xf   : > { %s1080_s25 = sshll.u32 %s1388_s21, 4  ;;  %s1300_s28 = sshll.u32 %s1388_s21, 3 }
  0x10   : > { %s341_s7 = scalar_lea.vmem %s1377_s1, %s1080_s25  ;;  %s351_s10 = scalar_lea.vmem %s1378_s2, %s1300_s28 }
  0x11   : > { %v386_v7 = vld [vmem:[%s341_s7] sm:$0xff]  ;;  %v387_v8 = vld [vmem:[%s341_s7 + $0x8] sm:$0xff]  ;;  %s331_s16 = scalar_lea.vmem %s1376_s0, %s1300_s28  ;;  %s361_s21 = scalar_lea.vmem %s1382_s6, %s1300_s28 }
  0x12   : > { %v395_v9 = vadd.f32 %v1061_v5, %v386_v7  ;;  %v396_v10 = vadd.f32 %v1061_v5, %v387_v8  ;;  %v1184_v11 = vld [vmem:[%s351_s10] sm:$0xff]  }
  0x13   : > { %619 = vrot.lane.b32.xlu0 %v1184_v11, %s1230_s11  ;;  %v625_v41 = vsel %vm557_vm4, %v1184_v11, 0  ;;  %v1086_v11 = vld [vmem:[%s331_s16] sm:$0xff]  }
  0x14   : > { %v399_v12 = vand.u32 2147483647, %v395_v9  ;;  %v400_v13 = vand.u32 2147483647, %v396_v10  ;;  %v397_v27 = vmax.f32 %v395_v9, 0.0  ;;  %v398_v29 = vmax.f32 %v396_v10, 0.0 }
  0x16   : > { %v401_v14 = vsub.f32 0.0, %v399_v12  ;;  %v402_v15 = vsub.f32 0.0, %v400_v13 }
  0x18   : > { %v403_v16 = vmul.f32 1.442695, %v401_v14  ;;  %v405_v17 = vmul.f32 1.442695, %v402_v15  ;;  %v1088_v15 = vunpack.c.h.bf16 %v1086_v11 }
  0x1a   : > { %1185 = vpow2.f32 %v403_v16  ;;  %v1087_v16 = vunpack.c.l.bf16 %v1086_v11 }
  0x1b   : > { %1187 = vpow2.f32 %v405_v17 }
  0x1c   : > { %1189 = vpow2.f32 %v383_v19 }
  0x24   : > { %v1186_v20 = vpop.eup %1185 }
  0x25   : > { %v1188_v21 = vpop.eup %1187  ;;  %v407_v22 = vadd.f32 1.0, %v1186_v20 }
  0x26   : > { %v408_v23 = vadd.f32 1.0, %v1188_v21  ;;  %v1190_v24 = vpop.eup %1189 }
  0x27   : > { %1191 = vlog2.f32 %v407_v22  ;;  %v385_v25 = vsub.f32 0.0, %v1190_v24 }
  0x28   : > { %1193 = vlog2.f32 %v408_v23 }
  0x29   : > { %v419_v32 = vrot.slane %v385_v25, %v418_v26 }
  0x31   : > { %v1192_v28 = vpop.eup %1191 }
  0x32   : > { %v1194_v30 = vpop.eup %1193  ;;  %v410_v31 = vmul.f32 0.6931472, %v1192_v28 }
  0x33   : > { %v412_v33 = vmul.f32 0.6931472, %v1194_v30 }
  0x34   : > { %v413_v34 = vadd.f32 %v410_v31, %v397_v27 }
  0x35   : > { %v414_v35 = vadd.f32 %v412_v33, %v398_v29 }
  0x36   : > { %v421_v37 = vmul.f32 %v419_v32, %v413_v34 }
  0x37   : > { %v422_v38 = vmul.f32 %v419_v32, %v414_v35 }
  0x39   : > { %v1129_v39 = vpack.c.bf16 %v422_v38, %v421_v37  ;;  %v1070_v38 = vld [vmem:[%s1381_s5] ss:$0 sm:$0xff] }
  0x3b   : > { %1130 = vmatprep.subr.bf16.mxu1 %v1129_v39 }
  0x3c   : > { %1132 = vmatpush3.bf16.msra.mxu1 %v1129_v39 }
  0x3d   : > { %1111 = vmatprep.subr.bf16.mxu1 %v1227_v1 }
  0x3f   : > { %1109 = vmatmul.mubr.msk.f32.vlgmr.msra.gmra.mrb[0].mxu1 %vm434_vm1, %v1063_v40 }
  0x40   : > { %1113 = vmatprep.mubr.msk.bf16.mxu1 %vm1228_vm0, %v1227_v1 }
  0x45   : > { %1112 = vmatpush3.bf16.xpose.msra.mxu1 %v625_v41  ;;  %v777_v41 = vmul.f32 %v1087_v16, %v1070_v38 }
  0x85   : > { %v620_v42 = vpop.permute.xlu0 %619 }
  0x86   : > { %1114 = vmatmul.mubr.msk.bf16.vlgmr.msra.gmra.mrb[4].mxu1 %vm557_vm4, %v620_v42  ;;  %1120 = vmatmul.mubr.msk.bf16.vlgmr.msra.gmra.mrb[0].mxu0 %vm557_vm4, %v620_v42 }
  0x87   : > { %1125 = vmatprep.mubr.msk.bf16.mxu0 %vm1228_vm0, %v1227_v1 }
 0x112   : > { %v1110_v44 = vpop.f32.mrb[0].mxu1 }
 0x113   : > { %v564_v45 = vsub.f32 0.0, %v1110_v44  ;;  %v507_v46 = vpop.f32.mrb[1].mxu1  ;;  %v518_v57 = vmul.f32 1.442695, %v1110_v44 }
 0x114   : > { %v563_v47 = vsub.f32 0.0, %v507_v46  ;;  %v516_v54 = vmul.f32 1.442695, %v507_v46 }
 0x115   : > { %v567_v48 = vmul.f32 1.442695, %v564_v45 }
 0x116   : > { %v565_v49 = vmul.f32 1.442695, %v563_v47 }
 0x117   : > { %1195 = vpow2.f32 %v567_v48 }
 0x118   : > { %1197 = vpow2.f32 %v565_v49 }
 0x119   : > { %1199 = vpow2.f32 %v516_v54 }
 0x11a   : > { %1201 = vpow2.f32 %v518_v57 }
 0x121   : > { %v1196_v50 = vpop.eup %1195 }
 0x122   : > { %v1198_v51 = vpop.eup %1197  ;;  %v570_v52 = vmul.f32 %v1196_v50, %v414_v35 }
 0x123   : > { %v569_v53 = vmul.f32 %v1198_v51, %v413_v34  ;;  %v1200_v59 = vpop.eup %1199 }
 0x124   : > { %578 = vperm.xlu1 %1169, %v570_v52   ;;  %v1202_v60 = vpop.eup %1201 }
 0x125   : > { %573 = vperm.xlu0 %1172, %v569_v53  }
 0x128   : > { %1170 = vset.pattern.permute.xlu1 %v1232_v55 }
 0x129   : > { %586 = vperm.xlu1 %1170, %v570_v52   ;;  %1174 = vset.pattern.permute.xlu0 %v1233_v56 }
 0x12a   : > { %590 = vperm.xlu0 %1174, %v569_v53  }
 0x12d   : > { %1171 = vset.pattern.permute.xlu1 %v1233_v56 }
 0x12e   : > { %594 = vperm.xlu1 %1171, %v570_v52   ;;  %1176 = vset.pattern.permute.xlu0 %v1234_v58 }
 0x12f   : > { %602 = vperm.xlu0 %1176, %v570_v52  }
 0x132   : > { %1173 = vset.pattern.permute.xlu1 %v1232_v55 }
 0x133   : > { %582 = vperm.xlu1 %1173, %v569_v53   ;;  %1178 = vset.pattern.permute.xlu0 %v1232_v55 }
 0x134   : > { %531 = vperm.xlu0 %1178, %v1200_v59  }
 0x137   : > { %1175 = vset.pattern.permute.xlu1 %v1234_v58 }
 0x138   : > { %598 = vperm.xlu1 %1175, %v569_v53   ;;  %1181 = vset.pattern.permute.xlu0 %v1233_v56 }
 0x139   : > { %543 = vperm.xlu0 %1181, %v1202_v60  }
 0x13c   : > { %1177 = vset.pattern.permute.xlu1 %v1231_v43  ;;  %v778_v43 = vmul.f32 %v1088_v15, %v1070_v38 }
 0x13d   : > { %522 = vperm.xlu1 %1177, %v1200_v59   ;;  %1183 = vset.pattern.permute.xlu0 %v1234_v58 }
 0x141   : > { %527 = vperm.xlu1 %1177, %v1202_v60  }
 0x145   : > { %1179 = vset.pattern.permute.xlu1 %v1232_v55 }
 0x146   : > { %535 = vperm.xlu1 %1179, %v1202_v60  }
 0x14a   : > { %1180 = vset.pattern.permute.xlu1 %v1233_v56 }
 0x14b   : > { %539 = vperm.xlu1 %1180, %v1200_v59  }
 0x14f   : > { %1182 = vset.pattern.permute.xlu1 %v1234_v58 }
 0x150   : > { %547 = vperm.xlu1 %1182, %v1200_v59  }
 0x154   : > { %551 = vperm.xlu1 %1182, %v1202_v60  }
 0x159   : > { %v661_v61 = vpop.f32.mrb[4].mxu1 }
 0x15a   : > { %v668_v62 = vsel %vm428_vm2, %v661_v61, 0.0  ;;  %v1115_v63 = vpop.f32.mrb[5].mxu1 }
 0x15b   : > { %v664_v0 = vpop.f32.mrb[6].mxu1 }
 0x15c   : > { %v669_v1 = vsel %vm429_vm3, %v664_v0, 0.0  ;;  %v1116_v4 = vpop.f32.mrb[7].mxu1 }
 0x15d   : > { %v670_v5 = vpack.c.bf16 %v669_v1, %v668_v62 }
 0x1a3   : > { %v579_v6 = vpop.permute.xlu1 %578 }
 0x1a4   : > { %v574_v7 = vpop.permute.xlu0 %573 }
 0x1a8   : > { %v587_v8 = vpop.permute.xlu1 %586 }
 0x1a9   : > { %v591_v9 = vpop.permute.xlu0 %590  ;;  %v606_v2 = vsel %vm554_vm5, %v579_v6, %v587_v8 }
 0x1ad   : > { %v595_v10 = vpop.permute.xlu1 %594 }
 0x1ae   : > { %v608_v13 = vsel %vm557_vm4, %v606_v2, %v595_v10  ;;  %v603_v3 = vpop.permute.xlu0 %602 }
 0x1af   : > { %v610_v17 = vsel %vm560_vm6, %v608_v13, %v603_v3 }
 0x1b0   : > { %v612_v21 = vmul.f32 %v1088_v15, %v610_v17 }
 0x1b2   : > { %v583_v12 = vpop.permute.xlu1 %582 }
 0x1b3   : > { %v605_v14 = vsel %vm554_vm5, %v574_v7, %v583_v12  ;;  %v532_v28 = vpop.permute.xlu0 %531 }
 0x1b4   : > { %v607_v19 = vsel %vm557_vm4, %v605_v14, %v591_v9 }
 0x1b7   : > { %v599_v18 = vpop.permute.xlu1 %598 }
 0x1b8   : > { %v609_v20 = vsel %vm560_vm6, %v607_v19, %v599_v18  ;;  %v544_v34 = vpop.permute.xlu0 %543 }
 0x1b9   : > { %v611_v22 = vmul.f32 %v1087_v16, %v609_v20 }
 0x1bb   : > { %v613_v23 = vpack.c.bf16 %v612_v21, %v611_v22 }
 0x1bc   : > { %v523_v24 = vpop.permute.xlu1 %522 }
 0x1bd   : > { %1124 = vmatpush3.bf16.msra.mxu0 %v613_v23  ;;  %v555_v29 = vsel %vm554_vm5, %v523_v24, %v532_v28 }
 0x1c0   : > { %v528_v25 = vpop.permute.xlu1 %527  ;;  %1126 = vmatmul.mubr.msk.bf16.vlgmr.msra.gmra.mrb[0].mxu0 %vm434_vm1, %v670_v5 }
 0x1c5   : > { %v536_v26 = vpop.permute.xlu1 %535 }
 0x1c6   : > { %v556_v32 = vsel %vm554_vm5, %v528_v25, %v536_v26 }
 0x1c7   : > { %v559_v36 = vsel %vm557_vm4, %v556_v32, %v544_v34 }
 0x1ca   : > { %v540_v27 = vpop.permute.xlu1 %539 }
 0x1cb   : > { %v558_v30 = vsel %vm557_vm4, %v555_v29, %v540_v27 }
 0x1cf   : > { %v548_v31 = vpop.permute.xlu1 %547 }
 0x1d0   : > { %v561_v33 = vsel %vm560_vm6, %v558_v30, %v548_v31 }
 0x1d3   : > { %v552_v35 = vpop.permute.xlu1 %551 }
 0x1d4   : > { %v562_v37 = vsel %vm560_vm6, %v559_v36, %v552_v35 }
 0x293   : > { %v761_v39 = vpop.f32.mrb[0].mxu0 }
 0x294   : > { %v768_v40 = vmul.f32 %v761_v39, %v561_v33  ;;  %v1127_v42 = vpop.f32.mrb[1].mxu0 }
 0x295   : > { %v764_v44 = vpop.f32.mrb[2].mxu0 }
 0x296   : > { %v769_v45 = vmul.f32 %v764_v44, %v562_v37  ;;  %v1128_v46 = vpop.f32.mrb[3].mxu0  ;;  %v779_v47 = vadd.f32 %v777_v41, %v768_v40 }
 0x298   : > { %v780_v48 = vadd.f32 %v778_v43, %v769_v45 }
 0x29a   : > { %v1092_v49 = vpack.c.bf16 %v780_v48, %v779_v47 }
 0x29c   : > { %1093 = vst [vmem:[%s361_s21] sm:$0xff] %v1092_v49  }
 0x29d PF: > { %s16_s23 = sadd.s32 1, %s1225_s23   ;;  %s1383_s21 = smov %s1221_s22 }
 0x29e   : > { %p13_p5 = scmp.ge.s32.totalorder %s16_s23, 4   ;;  %s1384_s22 = smov %s1386_s24 }
 0x2a0   :  { %15 = sbr.rel (!%p13_p5) target bundleno = 2 (0x2), region = 88 }

// kernel: backbone_forward.9
= control target key start
LH: loop header
LB: loop body
LE: loop exit
PB: predicated region body
PF: predicated region fallthrough
CT: control target
= control target key end

     0   :  { %v861_v2 = vmov 0   ;;  %vm38_vm0 = vcmask 523264   ;;  %s1143_s0 = inlined_call_operand.vmem [shape: bf16[32,64], index: 0, kind: input, shape index: {}]   ;;  %s1144_s1 = inlined_call_operand.vmem [shape: bf16[64,256], index: 1, kind: input, shape index: {}]   ;;  %s1145_s2 = inlined_call_operand.vmem [shape: f32[1,256], index: 2, kind: input, shape index: {}]   ;;  %s1146_s3 = inlined_call_operand.vmem [shape: bf16[64,256], index: 3, kind: input, shape index: {}]   ;;  %s1147_s4 = inlined_call_operand.vmem [shape: f32[1,256], index: 4, kind: input, shape index: {}]   ;;  %s1148_s5 = inlined_call_operand.vmem [shape: bf16[256,64], index: 5, kind: input, shape index: {}]   ;;  %s1149_s6 = inlined_call_operand.vmem [shape: f32[1,64], index: 6, kind: input, shape index: {}]   ;;  %s1150_s7 = inlined_call_operand.vmem [shape: f32[1,64], index: 7, kind: input, shape index: {}]   ;;  %s1151_s8 = inlined_call_operand.vmem [shape: f32[1,64], index: 8, kind: input, shape index: {}]   ;;  %s1152_s9 = inlined_call_operand.hbm [shape: f32[32,64], index: 9, kind: output, shape index: {}]  }
   0x1   :  { %v771_v0 = vld [vmem:[%s1144_s1 + $0x4] ss:$8 sps:$4 sm:$0xff]   ;;  %v773_v1 = vld [vmem:[%s1144_s1] ss:$8 sps:$4 sm:$0xff]   ;;  %156 = vmatprep.mubr.bf16.mxu1 %v861_v2  ;;  %v774_v3 = vld [vmem:[%s1144_s1 + $0x14] ss:$8 sps:$4 sm:$0xff]  }
   0x2   :  { %124 = vmatprep.subr.bf16.mxu1 %v771_v0  ;;  %v776_v4 = vld [vmem:[%s1144_s1 + $0x10] ss:$8 sps:$4 sm:$0xff]   ;;  %v777_v5 = vld [vmem:[%s1144_s1 + $0x24] ss:$8 sps:$4 sm:$0xff]   ;;  %v779_v6 = vld [vmem:[%s1144_s1 + $0x20] ss:$8 sps:$4 sm:$0xff]  }
   0x3   :  { %125 = vmatpush1.bf16.msra.mxu1 %v773_v1  ;;  %v780_v7 = vld [vmem:[%s1144_s1 + $0x34] ss:$8 sps:$4 sm:$0xff]   ;;  %v782_v8 = vld [vmem:[%s1144_s1 + $0x30] ss:$8 sps:$4 sm:$0xff]   ;;  %v783_v9 = vld [vmem:[%s1143_s0] sm:$0xff]  }
   0x4   :  { %126 = vmatprep.subr.bf16.mxu1 %v774_v3  ;;  %v786_v10 = vld [vmem:[%s1146_s3 + $0x4] ss:$8 sps:$4 sm:$0xff]   ;;  %v784_v11 = vld [vmem:[%s1146_s3] ss:$8 sps:$4 sm:$0xff]   ;;  %v790_v12 = vld [vmem:[%s1146_s3 + $0x14] ss:$8 sps:$4 sm:$0xff]  }
   0x5   :  { %v788_v13 = vld [vmem:[%s1146_s3 + $0x10] ss:$8 sps:$4 sm:$0xff]   ;;  %v793_v14 = vld [vmem:[%s1146_s3 + $0x24] ss:$8 sps:$4 sm:$0xff]   ;;  %v791_v16 = vld [vmem:[%s1146_s3 + $0x20] ss:$8 sps:$4 sm:$0xff]  }
   0x6   :  { %v787_v15 = vld [vmem:[%s1143_s0 + $0x8] sm:$0xff]  }
   0x7   :  { %127 = vmatpush1.bf16.msra.mxu1 %v776_v4 }
   0x8   :  { %128 = vmatprep.subr.bf16.mxu1 %v777_v5 }
   0xb   :  { %129 = vmatpush1.bf16.msra.mxu1 %v779_v6 }
   0xc   :  { %130 = vmatprep.subr.bf16.mxu1 %v780_v7 }
   0xf   :  { %131 = vmatpush1.bf16.msra.mxu1 %v782_v8 }
  0x10   :  { %237 = vmatprep.subr.bf16.mxu1 %v786_v10 }
  0x12   :  { %698 = vmatmul.mubr.msk.bf16.vlgmr.msra.gmra.mrb[0].mxu1 %vm38_vm0, %v783_v9 }
  0x13   :  { %166 = vmatprep.mubr.bf16.mxu1 %v861_v2  ;;  %238 = vmatpush1.bf16.msra.mxu1 %v784_v11 }
  0x14   :  { %239 = vmatprep.subr.bf16.mxu1 %v790_v12 }
  0x17   :  { %240 = vmatpush1.bf16.msra.mxu1 %v788_v13 }
  0x18   :  { %14 = vsyncpa [#allocation4], 0  ;;  %241 = vmatprep.subr.bf16.mxu1 %v793_v14  ;;  %v796_v17 = vld [vmem:[%s1146_s3 + $0x34] ss:$8 sps:$4 sm:$0xff]   ;;  %v794_v18 = vld [vmem:[%s1146_s3 + $0x30] ss:$8 sps:$4 sm:$0xff]   ;;  %v57_v35 = vlaneseq }
  0x19   :  { %v797_v19 = vld [vmem:[%s1148_s5 + $0x40] sm:$0xff]   ;;  %v799_v21 = vld [vmem:[%s1148_s5 + $0x48] sm:$0xff]   ;;  %v801_v23 = vld [vmem:[%s1148_s5 + $0x50] sm:$0xff]  }
  0x1a   :  { %699 = vmatmul.mubr.msk.bf16.gmra.mrb[4].mxu1 %vm38_vm0, %v787_v15  ;;  %v798_v20 = vld [vmem:[%s1148_s5] sm:$0xff]   ;;  %738 = vmatprep.subr.bf16.mxu0 %v797_v19  ;;  %v800_v22 = vld [vmem:[%s1148_s5 + $0x8] sm:$0xff]   ;;  %v802_v24 = vld [vmem:[%s1148_s5 + $0x10] sm:$0xff]   ;;  %v1022_v36 = vshrl.u32 %v57_v35, 7 }
  0x1b   :  { %242 = vmatpush1.bf16.msra.mxu1 %v791_v16  ;;  %269 = vmatprep.mubr.bf16.mxu1 %v861_v2  ;;  %v803_v25 = vld [vmem:[%s1148_s5 + $0x58] sm:$0xff]   ;;  %v805_v27 = vld [vmem:[%s1148_s5 + $0x60] sm:$0xff]   ;;  %v807_v29 = vld [vmem:[%s1148_s5 + $0x68] sm:$0xff]  }
  0x1c   :  { %243 = vmatprep.subr.bf16.mxu1 %v796_v17  ;;  %739 = vmatpush3.bf16.msra.mxu0 %v798_v20  ;;  %v804_v26 = vld [vmem:[%s1148_s5 + $0x18] sm:$0xff]   ;;  %v806_v28 = vld [vmem:[%s1148_s5 + $0x20] sm:$0xff]   ;;  %v808_v30 = vld [vmem:[%s1148_s5 + $0x28] sm:$0xff]   ;;  %v59_v37 = vsub.s32 0, %v1022_v36  ;;  %v63_v39 = vsub.s32 1, %v1022_v36 }
  0x1d   :  { %740 = vmatprep.subr.bf16.mxu0 %v799_v21  ;;  %v809_v31 = vld [vmem:[%s1148_s5 + $0x70] sm:$0xff]   ;;  %v811_v33 = vld [vmem:[%s1148_s5 + $0x78] sm:$0xff]   ;;  %v55_v38 = vld [vmem:[%s1145_s2] sm:$0x3] }
  0x1e   :  { %v810_v32 = vld [vmem:[%s1148_s5 + $0x30] sm:$0xff]   ;;  %v812_v34 = vld [vmem:[%s1148_s5 + $0x38] sm:$0xff]   ;;  %v60_v40 = vrot.slane %v55_v38, %v59_v37  ;;  %v64_v41 = vrot.slane %v55_v38, %v63_v39 }
  0x1f   :  { %244 = vmatpush1.bf16.msra.mxu1 %v794_v18 }
  0x20   :  { %741 = vmatpush3.bf16.msra.mxu0 %v800_v22 }
  0x21   :  { %742 = vmatprep.subr.bf16.mxu0 %v801_v23 }
  0x22   :  { %708 = vmatmul.mubr.msk.bf16.vlgmr.msra.gmra.mrb[8].mxu1 %vm38_vm0, %v783_v9 }
  0x23   :  { %279 = vmatprep.mubr.bf16.mxu1 %v861_v2 }
  0x24   :  { %743 = vmatpush3.bf16.msra.mxu0 %v802_v24  ;;  %v185_v24 = vld [vmem:[%s1147_s4] sm:$0x3] }
  0x25   :  { %744 = vmatprep.subr.bf16.mxu0 %v803_v25  ;;  %v190_v35 = vrot.slane %v185_v24, %v59_v37 }
  0x28   :  { %745 = vmatpush3.bf16.msra.mxu0 %v804_v26 }
  0x29   :  { %746 = vmatprep.subr.bf16.mxu0 %v805_v27 }
  0x2a   :  { %709 = vmatmul.mubr.msk.bf16.gmra.mrb[12].mxu1 %vm38_vm0, %v787_v15 }
  0x2c   :  { %747 = vmatpush3.bf16.msra.mxu0 %v806_v28 }
  0x2d   :  { %748 = vmatprep.subr.bf16.mxu0 %v807_v29 }
  0x30   :  { %749 = vmatpush3.bf16.msra.mxu0 %v808_v30 }
  0x31   :  { %750 = vmatprep.subr.bf16.mxu0 %v809_v31 }
  0x34   :  { %751 = vmatpush3.bf16.msra.mxu0 %v810_v32 }
  0x35   :  { %752 = vmatprep.subr.bf16.mxu0 %v811_v33 }
  0x38   :  { %753 = vmatpush3.bf16.msra.mxu0 %v812_v34 }
  0xe5   :  { %v158_v42 = vpop.f32.mrb[0].mxu1 }
  0xe6   :  { %v1033_v43 = vadd.f32 %v158_v42, %v60_v40  ;;  %v160_v44 = vpop.f32.mrb[1].mxu1 }
  0xe7   :  { %v1035_v45 = vadd.f32 %v160_v44, %v64_v41  ;;  %v162_v46 = vpop.f32.mrb[2].mxu1 }
  0xe8   :  { %v298_v47 = vmul.f32 0.044715, %v1033_v43  ;;  %v1038_v48 = vadd.f32 %v162_v46, %v60_v40  ;;  %v164_v49 = vpop.f32.mrb[3].mxu1 }
  0xe9   :  { %v299_v50 = vmul.f32 0.044715, %v1035_v45  ;;  %v1041_v51 = vadd.f32 %v164_v49, %v64_v41 }
  0xea   :  { %v306_v52 = vmul.f32 %v298_v47, %v1033_v43  ;;  %v300_v53 = vmul.f32 0.044715, %v1038_v48  ;;  %v290_v47 = vmul.f32 0.5, %v1033_v43 }
  0xeb   :  { %v307_v54 = vmul.f32 %v299_v50, %v1035_v45  ;;  %v301_v55 = vmul.f32 0.044715, %v1041_v51  ;;  %v293_v36 = vmul.f32 0.5, %v1041_v51 }
  0xec   :  { %v308_v56 = vmul.f32 %v300_v53, %v1038_v48  ;;  %v314_v57 = vmul.f32 %v306_v52, %v1033_v43  ;;  %v194_v53 = vrot.slane %v185_v24, %v63_v39 }
  0xed   :  { %v309_v58 = vmul.f32 %v301_v55, %v1041_v51  ;;  %v168_v59 = vpop.f32.mrb[4].mxu1  ;;  %v315_v60 = vmul.f32 %v307_v54, %v1035_v45  ;;  %v292_v55 = vmul.f32 0.5, %v1038_v48 }
  0xee   :  { %v1051_v61 = vadd.f32 %v168_v59, %v60_v40  ;;  %v170_v62 = vpop.f32.mrb[5].mxu1  ;;  %v322_v63 = vadd.f32 %v314_v57, %v1033_v43  ;;  %v316_v0 = vmul.f32 %v308_v56, %v1038_v48 }
  0xef   :  { %v1055_v1 = vadd.f32 %v170_v62, %v64_v41  ;;  %v172_v2 = vpop.f32.mrb[6].mxu1  ;;  %v317_v3 = vmul.f32 %v309_v58, %v1041_v51  ;;  %v323_v11 = vadd.f32 %v315_v60, %v1035_v45 }
  0xf0   :  { %v302_v4 = vmul.f32 0.044715, %v1051_v61  ;;  %v1059_v5 = vadd.f32 %v172_v2, %v60_v40  ;;  %v174_v6 = vpop.f32.mrb[7].mxu1  ;;  %v330_v7 = vmul.f32 0.7978846, %v322_v63  ;;  %v324_v8 = vadd.f32 %v316_v0, %v1038_v48 }
  0xf1   :  { %v303_v9 = vmul.f32 0.044715, %v1055_v1  ;;  %v1063_v10 = vadd.f32 %v174_v6, %v64_v41  ;;  %v325_v19 = vadd.f32 %v317_v3, %v1041_v51  ;;  %v331_v23 = vmul.f32 0.7978846, %v323_v11 }
  0xf2   :  { %v310_v12 = vmul.f32 %v302_v4, %v1051_v61  ;;  %v304_v13 = vmul.f32 0.044715, %v1059_v5  ;;  %813 = vtanh.f32 %v330_v7  ;;  %v332_v14 = vmul.f32 0.7978846, %v324_v8 }
  0xf3   :  { %v311_v15 = vmul.f32 %v303_v9, %v1055_v1  ;;  %v305_v16 = vmul.f32 0.044715, %v1063_v10  ;;  %v333_v28 = vmul.f32 0.7978846, %v325_v19  ;;  %v291_v2 = vmul.f32 0.5, %v1035_v45 }
  0xf4   :  { %v312_v17 = vmul.f32 %v304_v13, %v1059_v5  ;;  %815 = vtanh.f32 %v332_v14  ;;  %v318_v18 = vmul.f32 %v310_v12, %v1051_v61  ;;  %v294_v48 = vmul.f32 0.5, %v1051_v61 }
  0xf5   :  { %v313_v20 = vmul.f32 %v305_v16, %v1063_v10  ;;  %v271_v21 = vpop.f32.mrb[8].mxu1  ;;  %v319_v22 = vmul.f32 %v311_v15, %v1055_v1  ;;  %817 = vtanh.f32 %v331_v23  ;;  %v296_v51 = vmul.f32 0.5, %v1059_v5 }
  0xf6   :  { %v273_v25 = vpop.f32.mrb[9].mxu1  ;;  %v326_v26 = vadd.f32 %v318_v18, %v1051_v61  ;;  %v320_v27 = vmul.f32 %v312_v17, %v1059_v5  ;;  %819 = vtanh.f32 %v333_v28  ;;  %v272_v46 = vadd.f32 %v271_v21, %v190_v35 }
  0xf7   :  { %v275_v29 = vpop.f32.mrb[10].mxu1  ;;  %v327_v30 = vadd.f32 %v319_v22, %v1055_v1  ;;  %v321_v31 = vmul.f32 %v313_v20, %v1063_v10  ;;  %v274_v43 = vadd.f32 %v273_v25, %v194_v53  ;;  %v295_v17 = vmul.f32 0.5, %v1055_v1 }
  0xf8   :  { %v277_v32 = vpop.f32.mrb[11].mxu1  ;;  %v334_v33 = vmul.f32 0.7978846, %v326_v26  ;;  %v328_v34 = vadd.f32 %v320_v27, %v1059_v5  ;;  %v276_v62 = vadd.f32 %v275_v29, %v190_v35  ;;  %v297_v61 = vmul.f32 0.5, %v1063_v10 }
  0xf9   :  { %v335_v38 = vmul.f32 0.7978846, %v327_v30  ;;  %v329_v40 = vadd.f32 %v321_v31, %v1063_v10  ;;  %v278_v7 = vadd.f32 %v277_v32, %v194_v53  ;;  %v862_v5 = vmov 0.0  }
  0xfa   :  { %821 = vtanh.f32 %v334_v33  ;;  %v336_v41 = vmul.f32 0.7978846, %v328_v34  ;;  %39 = vst.msk [vmem:[#allocation2] sm:$0xff] %vm38_vm0, %v862_v5  ;;  %40 = vst.msk [vmem:[#allocation2 + $0x8] sm:$0xff] %vm38_vm0, %v862_v5 }
  0xfb   :  { %823 = vtanh.f32 %v335_v38  ;;  %v337_v42 = vmul.f32 0.7978846, %v329_v40  ;;  %41 = vst.msk [vmem:[#allocation2 + $0x10] sm:$0xff] %vm38_vm0, %v862_v5  ;;  %42 = vst.msk [vmem:[#allocation2 + $0x18] sm:$0xff] %vm38_vm0, %v862_v5 }
  0xfc   :  { %v814_v44 = vpop.eup %813  ;;  %825 = vtanh.f32 %v336_v41 }
  0xfd   :  { %v346_v49 = vadd.f32 1.0, %v814_v44  ;;  %v281_v50 = vpop.f32.mrb[12].mxu1  ;;  %827 = vtanh.f32 %v337_v42 }
  0xfe   :  { %v816_v52 = vpop.eup %815  ;;  %v283_v37 = vpop.f32.mrb[13].mxu1  ;;  %v282_v11 = vadd.f32 %v281_v50, %v190_v35 }
  0xff   :  { %v354_v54 = vmul.f32 %v346_v49, %v290_v47  ;;  %v348_v56 = vadd.f32 1.0, %v816_v52  ;;  %v285_v57 = vpop.f32.mrb[14].mxu1  ;;  %v818_v59 = vpop.eup %817  ;;  %v284_v16 = vadd.f32 %v283_v37, %v194_v53  ;;  %v730_v37 = vld [vmem:[%s1143_s0] sm:$0xff]  }
 0x100   :  { %v287_v58 = vpop.f32.mrb[15].mxu1  ;;  %v820_v0 = vpop.eup %819  ;;  %v347_v3 = vadd.f32 1.0, %v818_v59  ;;  %v286_v26 = vadd.f32 %v285_v57, %v190_v35 }
 0x101   :  { %v362_v60 = vmul.f32 %v354_v54, %v272_v46  ;;  %v356_v63 = vmul.f32 %v348_v56, %v292_v55  ;;  %v349_v39 = vadd.f32 1.0, %v820_v0  ;;  %v288_v30 = vadd.f32 %v287_v58, %v194_v53  ;;  %v370_v35 = vld [vmem:[#allocation2] sm:$0xff]  ;;  %v371_v42 = vld [vmem:[#allocation2 + $0x8] sm:$0xff] }
 0x102   :  { %v355_v8 = vmul.f32 %v347_v3, %v291_v2  ;;  %v372_v52 = vld [vmem:[#allocation2 + $0x10] sm:$0xff]  ;;  %v373_v56 = vld [vmem:[#allocation2 + $0x18] sm:$0xff]  ;;  %v726_v58 = vld [vmem:[%s1149_s6] ss:$0 sm:$0xff]  ;;  %v732_v2 = vunpack.c.h.bf16 %v730_v37 }
 0x103   :  { %v364_v4 = vmul.f32 %v356_v63, %v276_v62  ;;  %v357_v13 = vmul.f32 %v349_v39, %v293_v36  ;;  %v731_v62 = vunpack.c.l.bf16 %v730_v37  ;;  %v737_v39 = vld [vmem:[%s1143_s0 + $0x8] sm:$0xff]  }
 0x104   :  { %v822_v6 = vpop.eup %821  ;;  %v363_v18 = vmul.f32 %v355_v8, %v274_v43 }
 0x105   :  { %v824_v9 = vpop.eup %823  ;;  %v350_v12 = vadd.f32 1.0, %v822_v6  ;;  %v374_v14 = vpack.c.bf16 %v364_v4, %v362_v60  ;;  %v365_v22 = vmul.f32 %v357_v13, %v278_v7 }
 0x106   :  { %v826_v15 = vpop.eup %825  ;;  %v351_v45 = vadd.f32 1.0, %v824_v9 }
 0x107   :  { %v828_v19 = vpop.eup %827  ;;  %v358_v20 = vmul.f32 %v350_v12, %v294_v48  ;;  %v352_v21 = vadd.f32 1.0, %v826_v15  ;;  %v375_v28 = vpack.c.bf16 %v365_v22, %v363_v18  ;;  %v735_v48 = vunpack.c.l.bf16 %v737_v39 }
 0x108   :  { %v359_v23 = vmul.f32 %v351_v45, %v295_v17  ;;  %v353_v24 = vadd.f32 1.0, %v828_v19  ;;  %v736_v12 = vunpack.c.h.bf16 %v737_v39 }
 0x109   :  { %v366_v25 = vmul.f32 %v358_v20, %v282_v11  ;;  %v360_v27 = vmul.f32 %v352_v21, %v296_v51  ;;  %538 = vmatprep.mubr.bf16.mxu0 %v375_v28 }
 0x10a   :  { %v367_v29 = vmul.f32 %v359_v23, %v284_v16  ;;  %v361_v31 = vmul.f32 %v353_v24, %v297_v61  ;;  %539 = vmatmul.mubr.bf16.vlgmr.msra.gmra.mrb[0].mxu0 %v374_v14 }
 0x10b   :  { %v368_v1 = vmul.f32 %v360_v27, %v286_v26 }
 0x10c   :  { %v369_v32 = vmul.f32 %v361_v31, %v288_v30 }
 0x10d   :  { %v376_v33 = vpack.c.bf16 %v368_v1, %v366_v25 }
 0x10e   :  { %v377_v34 = vpack.c.bf16 %v369_v32, %v367_v29 }
 0x110   :  { %546 = vmatprep.mubr.bf16.mxu0 %v377_v34 }
 0x112   :  { %547 = vmatmul.mubr.bf16.gmra.mrb[4].mxu0 %v376_v33 }
 0x1dd   :  { %v754_v10 = vpop.f32.mrb[0].mxu0 }
 0x1de   :  { %v755_v38 = vpop.f32.mrb[1].mxu0 }
 0x1df   :  { %v756_v40 = vadd.f32 %v755_v38, %v754_v10  ;;  %v757_v41 = vpop.f32.mrb[2].mxu0 }
 0x1e0   :  { %v758_v44 = vpop.f32.mrb[3].mxu0 }
 0x1e1   :  { %v555_v46 = vadd.f32 %v756_v40, %v370_v35  ;;  %v759_v47 = vadd.f32 %v758_v44, %v757_v41 }
 0x1e3   :  { %559 = vst.msk [vmem:[#allocation2] sm:$0xff] %vm38_vm0, %v555_v46  ;;  %v556_v49 = vadd.f32 %v759_v47, %v371_v42 }
 0x1e5   :  { %560 = vst.msk [vmem:[#allocation2 + $0x8] sm:$0xff] %vm38_vm0, %v556_v49  ;;  %v760_v50 = vpop.f32.mrb[4].mxu0 }
 0x1e6   :  { %v761_v53 = vpop.f32.mrb[5].mxu0 }
 0x1e7   :  { %v762_v54 = vadd.f32 %v761_v53, %v760_v50  ;;  %v763_v55 = vpop.f32.mrb[6].mxu0 }
 0x1e8   :  { %v764_v57 = vpop.f32.mrb[7].mxu0 }
 0x1e9   :  { %v557_v59 = vadd.f32 %v762_v54, %v372_v52  ;;  %v765_v60 = vadd.f32 %v764_v57, %v763_v55  ;;  %v727_v52 = vld [vmem:[%s1150_s7] ss:$0 sm:$0xff]  ;;  %s863_s7 = smov [#allocation3]  }
 0x1ea   :  { %v566_v63 = vld [vmem:[#allocation2] sm:$0xff]  ;;  %s677_s18 = sshll.u32 %s863_s7, 4  ;;  %s678_s18 = int_to_ptr.vmem [resolvable:$true] %s677_s18 }
 0x1eb   :  { %561 = vst.msk [vmem:[#allocation2 + $0x10] sm:$0xff] %vm38_vm0, %v557_v59  ;;  %v558_v0 = vadd.f32 %v765_v60, %v373_v56  ;;  %v577_v43 = vadd.f32 %v726_v58, %v566_v63  ;;  %v728_v54 = vld [vmem:[%s1151_s8] ss:$0 sm:$0xff]  ;;  %s837_s8 = scalar_lea.vmem %s678_s18, 512  ;;  %p842_p1 = scmp.lt.s32.totalorder %s678_s18, %s678_s18 }
 0x1ec   :  { %v567_v3 = vld [vmem:[#allocation2 + $0x8] sm:$0xff]  ;;  %p838_p0 = scmp.ne.s32.totalorder %s678_s18, %s837_s8  ;;  %p843_p2 = scmp.lt.s32.totalorder %s837_s8, %s837_s8 }
 0x1ed   :  { %562 = vst.msk [vmem:[#allocation2 + $0x18] sm:$0xff] %vm38_vm0, %v558_v0  ;;  %v589_v4 = vadd.f32 %v731_v62, %v577_v43  ;;  %v578_v36 = vadd.f32 %v726_v58, %v567_v3 }
 0x1ee   :  { %p844_p3 = por %p843_p2, %p842_p1 }
 0x1ef   :  { %v593_v6 = vsel %vm38_vm0, %v589_v4, 0.0  ;;  %v590_v7 = vadd.f32 %v732_v2, %v578_v36 }
 0x1f0   :  { %594 = vadd.xlane.f32.xlu0 %v593_v6  ;;  %p845_p4 = pnand %p844_p3, %p838_p0 }
 0x1f1   :  { %v596_v9 = vsel %vm38_vm0, %v590_v7, 0.0 }
 0x1f2   :  { %v568_v8 = vld [vmem:[#allocation2 + $0x10] sm:$0xff] }
 0x1f3   :  { %v579_v11 = vadd.f32 %v726_v58, %v568_v8 }
 0x1f4   :  { %597 = vadd.xlane.f32.xlu0 %v596_v9  ;;  %v569_v13 = vld [vmem:[#allocation2 + $0x18] sm:$0xff] }
 0x1f5   :  { %v591_v14 = vadd.f32 %v735_v48, %v579_v11  ;;  %v580_v15 = vadd.f32 %v726_v58, %v569_v13 }
 0x1f7   :  { %v599_v16 = vsel %vm38_vm0, %v591_v14, 0.0  ;;  %v592_v17 = vadd.f32 %v736_v12, %v580_v15 }
 0x1f8   :  { %600 = vadd.xlane.f32.xlu1 %v599_v16 }
 0x1f9   :  { %v602_v45 = vsel %vm38_vm0, %v592_v17, 0.0 }
 0x1fc   :  { %603 = vadd.xlane.f32.xlu1 %v602_v45 }
 0x27d   :  { %v595_v18 = vpop.xlane.xlu0 %594 }
 0x27e   :  { %v606_v19 = vmul.f32 0.015625, %v595_v18 }
 0x280   :  { %v610_v20 = vsub.f32 %v589_v4, %v606_v19 }
 0x281   :  { %v598_v51 = vpop.xlane.xlu0 %597 }
 0x282   :  { %v607_v21 = vmul.f32 0.015625, %v598_v51  ;;  %v614_v22 = vmul.f32 %v610_v20, %v610_v20 }
 0x284   :  { %v611_v23 = vsub.f32 %v590_v7, %v607_v21  ;;  %v618_v61 = vsel %vm38_vm0, %v614_v22, 0.0 }
 0x285   :  { %v601_v24 = vpop.xlane.xlu1 %600  ;;  %619 = vadd.xlane.f32.xlu0 %v618_v61 }
 0x286   :  { %v608_v25 = vmul.f32 0.015625, %v601_v24  ;;  %v615_v26 = vmul.f32 %v611_v23, %v611_v23 }
 0x288   :  { %v612_v27 = vsub.f32 %v591_v14, %v608_v25  ;;  %v621_v28 = vsel %vm38_vm0, %v615_v26, 0.0 }
 0x289   :  { %v604_v29 = vpop.xlane.xlu1 %603  ;;  %622 = vadd.xlane.f32.xlu1 %v621_v28 }
 0x28a   :  { %v609_v30 = vmul.f32 0.015625, %v604_v29  ;;  %v616_v31 = vmul.f32 %v612_v27, %v612_v27 }
 0x28c   :  { %v613_v1 = vsub.f32 %v592_v17, %v609_v30  ;;  %v624_v32 = vsel %vm38_vm0, %v616_v31, 0.0 }
 0x28d   :  { %625 = vadd.xlane.f32.xlu0 %v624_v32 }
 0x28e   :  { %v617_v33 = vmul.f32 %v613_v1, %v613_v1 }
 0x290   :  { %v627_v34 = vsel %vm38_vm0, %v617_v33, 0.0 }
 0x291   :  { %628 = vadd.xlane.f32.xlu1 %v627_v34 }
 0x312   :  { %v620_v5 = vpop.xlane.xlu0 %619 }
 0x313   :  { %v630_v10 = vmul.f32 0.015625, %v620_v5 }
 0x315   :  { %v634_v35 = vadd.f32 1e-05, %v630_v10 }
 0x316   :  { %v623_v38 = vpop.xlane.xlu1 %622 }
 0x317   :  { %829 = vrsqrt.f32 %v634_v35  ;;  %v631_v40 = vmul.f32 0.015625, %v623_v38 }
 0x319   :  { %v635_v41 = vadd.f32 1e-05, %v631_v40 }
 0x31a   :  { %v626_v42 = vpop.xlane.xlu0 %625 }
 0x31b   :  { %831 = vrsqrt.f32 %v635_v41  ;;  %v632_v44 = vmul.f32 0.015625, %v626_v42 }
 0x31d   :  { %v636_v46 = vadd.f32 1e-05, %v632_v44 }
 0x31e   :  { %v629_v47 = vpop.xlane.xlu1 %628 }
 0x31f   :  { %833 = vrsqrt.f32 %v636_v46  ;;  %v633_v49 = vmul.f32 0.015625, %v629_v47 }
 0x321   :  { %v830_v50 = vpop.eup %829  ;;  %v637_v53 = vadd.f32 1e-05, %v633_v49 }
 0x322   :  { %v642_v37 = vmul.f32 %v830_v50, %v610_v20 }
 0x323   :  { %835 = vrsqrt.f32 %v637_v53 }
 0x324   :  { %v653_v55 = vmul.f32 %v727_v52, %v642_v37 }
 0x325   :  { %v832_v56 = vpop.eup %831 }
 0x326   :  { %v664_v57 = vadd.f32 %v728_v54, %v653_v55  ;;  %v643_v58 = vmul.f32 %v832_v56, %v611_v23 }
 0x328   :  { %668 = vst.msk [vmem:[#allocation3] sm:$0xff] %vm38_vm0, %v664_v57  ;;  %v654_v59 = vmul.f32 %v727_v52, %v643_v58 }
 0x329   :  { %v834_v60 = vpop.eup %833 }
 0x32a   :  { %v665_v62 = vadd.f32 %v728_v54, %v654_v59  ;;  %v644_v63 = vmul.f32 %v834_v60, %v612_v27 }
 0x32c   :  { %669 = vst.msk [vmem:[#allocation3 + $0x8] sm:$0xff] %vm38_vm0, %v665_v62  ;;  %v655_v0 = vmul.f32 %v727_v52, %v644_v63 }
 0x32d   :  { %v836_v43 = vpop.eup %835 }
 0x32e   :  { %v666_v2 = vadd.f32 %v728_v54, %v655_v0  ;;  %v645_v3 = vmul.f32 %v836_v43, %v613_v1 }
 0x330   :  { %670 = vst.msk [vmem:[#allocation3 + $0x10] sm:$0xff] %vm38_vm0, %v666_v2  ;;  %v656_v4 = vmul.f32 %v727_v52, %v645_v3 }
 0x332   :  { %v667_v36 = vadd.f32 %v728_v54, %v656_v4 }
 0x334   :  { %671 = vst.msk [vmem:[#allocation3 + $0x18] sm:$0xff] %vm38_vm0, %v667_v36 }
 0x335   :  { %848 = shalt.err (!%p845_p4)
}
 0x336   :  { %s849_s21 = scalar_lea.hbm %s1152_s9, 512 }
 0x337   :  { %p850_p5 = scmp.ne.s32.totalorder %s1152_s9, %s849_s21  ;;  %p853_p6 = scmp.lt.u32.totalorder %s849_s21, %s1152_s9 }
 0x339   :  { %p855_p7 = pnand %p853_p6, %p850_p5 }
 0x33b   :  { %858 = shalt.err (!%p855_p7)
}
 0x33c   :  { %s864_s26 = smov 128   ;;  %s865_s27 = smov 8  }
 0x33d   :  { %683 = dma.vmem_to_hbm [thread:$0]  %s678_s18, 512, %s1152_s9, [#allocation4], %s864_s26, %s864_s26, %s865_s27  }
 0x33e   :  { %859 = dma.done.wait [#allocation4], 512  }
 0x33f   :  { %860 = vsyncadd [#allocation4], 4294966784 }
 0x340   :  { %687 = vsyncpa [#allocation4], 1 }

</bundles_post_ra>
